<compile_context>
chip_gen: v7x
topology: tpu7x:2x2x1
jax: 0.10.0
libtpu: 0.0.40
codegen_flags: <defaults>
</compile_context>

<pallas_src>
import functools

import jax
import jax.numpy as jnp
import numpy as np
from jax.experimental import pallas as pl
from jax.experimental.pallas import tpu as pltpu


def _silu(v):
    return v * jax.nn.sigmoid(v)


def ggb_kernel(stats_ref, x_ref, alpha_ref, alpha_t_ref, b_ref, wk_ref,
               gamma_ref, beta_ref, lw_ref, lb_ref, o_ref,
               *, order: int, mxu_dtype):
    """One batch tile of the GGB_linear_no_layer forward (eval mode).

    stats_ref:   (1, 2)  SMEM  [scale, shift] with xn = x*scale + shift
    x_ref:       (Bt, F) VMEM  input tile (f32)
    alpha_ref:   (F, F)        SiLU(alpha_w)            (MXU dtype, precomputed)
    alpha_t_ref: (F, F)        SiLU(alpha_w).T          (MXU dtype, precomputed)
    b_ref:       (1, F)        gegenbauer bias (f32)
    wk_ref:      ((order+1)*F, H) k-major poly weight   (MXU dtype)
    gamma_ref:   (1, H)        LayerNorm weight (f32)
    beta_ref:    (1, H)        LayerNorm bias   (f32)
    lw_ref:      (H, O_pad)    final linear W^T, lane-padded (MXU dtype)
    lb_ref:      (1, O_pad)    final linear bias, lane-padded (f32)
    o_ref:       (Bt, O_pad)   output tile (padded lanes are zero)
    """
    F = x_ref.shape[-1]
    x = x_ref[...]
    scale = stats_ref[0, 0]
    shift = stats_ref[0, 1]
    xn = x * scale + shift                       # whole-tensor min/max norm, folded

    alpha = alpha_ref[...]                       # already SiLU'd (wrapper), MXU dtype
    alpha_t = alpha_t_ref[...]
    xn_mx = xn.astype(mxu_dtype)

    # Gegenbauer recurrence with incremental projection: acc += P_k @ W_k.
    P0 = jnp.ones_like(xn)
    acc = jnp.dot(P0.astype(mxu_dtype), wk_ref[pl.ds(0, F), :],
                  preferred_element_type=jnp.float32)
    if order >= 1:
        # F.linear(xn, silu(alpha), bias) == xn @ silu(alpha).T + bias
        xa = jnp.dot(xn_mx, alpha_t, preferred_element_type=jnp.float32)
        P1 = 2.0 * (xa + b_ref[...])
        acc += jnp.dot(P1.astype(mxu_dtype), wk_ref[pl.ds(F, F), :],
                       preferred_element_type=jnp.float32)
        p_prev, p_cur = P0, P1
        for n in range(1, order):
            first = 2.0 * (n * xn + xa) * p_cur
            # P @ ((n-1)I + 2*alpha) == (n-1)*P + 2*(P @ alpha): no eye matmul.
            second = ((n - 1) * p_prev
                      + 2.0 * jnp.dot(p_prev.astype(mxu_dtype), alpha,
                                      preferred_element_type=jnp.float32))
            p_next = (first - second) / (n + 1)
            acc += jnp.dot(p_next.astype(mxu_dtype),
                           wk_ref[pl.ds((n + 1) * F, F), :],
                           preferred_element_type=jnp.float32)
            p_prev, p_cur = p_cur, p_next

    # LayerNorm over hidden dim (torch defaults: eps=1e-5, biased variance),
    # single pass: var = E[x^2] - E[x]^2.
    inv_h = 1.0 / acc.shape[-1]
    mean = jnp.sum(acc, axis=-1, keepdims=True) * inv_h
    ex2 = jnp.sum(acc * acc, axis=-1, keepdims=True) * inv_h
    var = ex2 - mean * mean
    h = (acc - mean) * jax.lax.rsqrt(var + 1e-5)
    h = h * gamma_ref[...] + beta_ref[...]

    # Base activation (SiLU).  Dropout (p=0.2) is identity at inference.
    # TODO(synk): training-mode dropout would need pltpu.prng_seed/prng_random_bits.
    h = _silu(h)

    # Final linear (lane-padded output -> unmasked full-width store).
    out = jnp.dot(h.astype(mxu_dtype), lw_ref[...],
                  preferred_element_type=jnp.float32) + lb_ref[...]
    o_ref[...] = out.astype(o_ref.dtype)


def _pick_batch_tile(B):
    cands = (1024, 512, 256, 128, 64, 32, 16)
    # Prefer the largest tile whose tile count is even and >= 2 (both v7x TCs busy),
    # then largest with >= 2 tiles, else one full-batch tile.
    for t in cands:
        if B % t == 0 and (B // t) >= 2 and (B // t) % 2 == 0:
            return t
    for t in cands:
        if B % t == 0 and (B // t) >= 2:
            return t
    return B


def _vmem_cap_bytes():
    # 48 MiB fallback is safe on v7x (64 MiB / TC); raise toward ~100 MiB on
    # 128 MiB parts (v5e / v6e) when the chip can be queried.
    try:
        info = pltpu.get_tpu_info()
        for name in ("vmem_capacity_bytes", "vmem_size_bytes", "vmem_bytes"):
            if hasattr(info, name):
                phys = int(getattr(info, name))
                if phys > 0:
                    return int(min(phys * 3 // 4, 100 * 2**20))
    except Exception:
        pass
    return 48 * 2**20


def ggb_linear_forward(x, alpha_w, bias, poly_w, ln_gamma, ln_beta,
                       lin_w, lin_b, *, polynomial_order=3,
                       batch_tile=None, mxu_dtype=jnp.bfloat16):
    x = x.astype(jnp.float32)
    B, F = x.shape
    H = poly_w.shape[0]
    O = lin_w.shape[0]
    K = polynomial_order + 1
    O_pad = ((O + 127) // 128) * 128
    is_f32_mxu = np.dtype(mxu_dtype) == np.dtype(np.float32)
    out_dtype = jnp.float32 if is_f32_mxu else jnp.bfloat16

    # Whole-tensor min/max folded into (scale, shift); computed here (tiny XLA
    # reduce) so the kernel tiles over batch without changing semantics.
    xmin = jnp.min(x)
    xmax = jnp.max(x)
    scale = 2.0 / (xmax - xmin + 1e-8)
    shift = -xmin * scale - 1.0
    stats = jnp.stack([scale, shift]).reshape(1, 2).astype(jnp.float32)

    # SiLU(alpha) hoisted out of the kernel (was 2*F^2 sigmoids per tile on EUP).
    alpha_act = _silu(alpha_w.astype(jnp.float32))
    alpha_mx = alpha_act.astype(mxu_dtype)
    alpha_t_mx = alpha_act.T.astype(mxu_dtype)

    # k-major poly weight: wk[k*F + j, h] == poly_w[h, j*K + k], so the per-order
    # slice wk[k*F:(k+1)*F] projects basis P_k (matches torch stack(...,-1).view()).
    wk = jnp.transpose(poly_w.astype(jnp.float32).reshape(H, F, K),
                       (2, 1, 0)).reshape(K * F, H).astype(mxu_dtype)

    b2 = bias.reshape(1, F).astype(jnp.float32)
    g2 = ln_gamma.reshape(1, H).astype(jnp.float32)
    be2 = ln_beta.reshape(1, H).astype(jnp.float32)

    pad_o = O_pad - O
    lw_pad = jnp.pad(lin_w.T.astype(jnp.float32),
                     ((0, 0), (0, pad_o))).astype(mxu_dtype)
    lb_pad = jnp.pad(lin_b.reshape(1, O).astype(jnp.float32), ((0, 0), (0, pad_o)))

    if batch_tile is None:
        batch_tile = _pick_batch_tile(B)
    assert B % batch_tile == 0, "batch_tile must divide batch size"
    n_tiles = B // batch_tile

    # VMEM budget: weights (conservatively x2 in case single-buffering is not
    # honoured) + double-buffered x/out tiles + live basis/LN temporaries.
    w_item = np.dtype(mxu_dtype).itemsize
    out_item = np.dtype(out_dtype).itemsize
    weight_bytes = ((alpha_mx.size + alpha_t_mx.size + wk.size + lw_pad.size) * w_item
                    + (b2.size + g2.size + be2.size + lb_pad.size) * 4)
    tile_bytes = 2 * batch_tile * F * 4 + 2 * batch_tile * O_pad * out_item
    live_bytes = 6 * batch_tile * F * 4 + 3 * batch_tile * H * 4
    vmem_limit = int(min(max(2 * (2 * weight_bytes + tile_bytes + live_bytes),
                             32 * 2**20), _vmem_cap_bytes()))

    kernel = functools.partial(ggb_kernel, order=polynomial_order,
                               mxu_dtype=mxu_dtype)

    def build_and_call(single_buffer_weights):
        def wspec(shape):
            # Constant-index weights: single-buffer when supported.
            if single_buffer_weights:
                return pl.BlockSpec(shape, lambda i: (0, 0),
                                    pipeline_mode=pl.Buffered(1))
            return pl.BlockSpec(shape, lambda i: (0, 0))

        grid_spec = pltpu.PrefetchScalarGridSpec(
            num_scalar_prefetch=0,
            grid=(n_tiles,),
            in_specs=[
                pl.BlockSpec(memory_space=pltpu.MemorySpace.SMEM),  # (scale, shift)
                pl.BlockSpec((batch_tile, F), lambda i: (i, 0)),    # x tile
                wspec((F, F)),                                      # silu(alpha)
                wspec((F, F)),                                      # silu(alpha).T
                wspec((1, F)),                                      # gegenbauer bias
                wspec((K * F, H)),                                  # k-major poly W
                wspec((1, H)),                                      # LN gamma
                wspec((1, H)),                                      # LN beta
                wspec((H, O_pad)),                                  # final linear W^T
                wspec((1, O_pad)),                                  # final linear b
            ],
            out_specs=pl.BlockSpec((batch_tile, O_pad), lambda i: (i, 0)),
        )
        return pl.pallas_call(
            kernel,
            out_shape=jax.ShapeDtypeStruct((B, O_pad), out_dtype),
            grid_spec=grid_spec,
            compiler_params=pltpu.CompilerParams(
                dimension_semantics=("parallel",),
                vmem_limit_bytes=vmem_limit),
        )(stats, x, alpha_mx, alpha_t_mx, b2, wk, g2, be2, lw_pad, lb_pad)

    if hasattr(pl, "Buffered"):
        try:
            out_pad = build_and_call(True)
        except Exception:
            out_pad = build_and_call(False)
    else:
        out_pad = build_and_call(False)

    return out_pad[:, :O].astype(jnp.float32)


# ---------------- pure-JAX reference (mirrors the PyTorch forward, eval mode) ----
def ggb_reference(x, alpha_w, bias, poly_w, ln_gamma, ln_beta, lin_w, lin_b,
                  *, polynomial_order=3):
    xmin, xmax = jnp.min(x), jnp.max(x)
    xn = 2.0 * (x - xmin) / (xmax - xmin + 1e-8) - 1.0
    alpha = _silu(alpha_w)
    P0 = jnp.ones_like(xn)
    P1 = 2.0 * (xn @ alpha.T + bias)
    polys = [P0, P1]
    F_ = xn.shape[1]
    for n in range(1, polynomial_order):
        first = 2.0 * (n * xn + xn @ alpha.T) * polys[-1]
        stm = (n - 1) * jnp.eye(F_, dtype=xn.dtype) + 2.0 * alpha
        polys.append((first - polys[-2] @ stm) / (n + 1))
    basis = jnp.stack(polys, axis=-1).reshape(xn.shape[0], -1)
    po = basis @ poly_w.T
    mean = jnp.mean(po, axis=-1, keepdims=True)
    var = jnp.mean((po - mean) ** 2, axis=-1, keepdims=True)
    h = (po - mean) / jnp.sqrt(var + 1e-5) * ln_gamma + ln_beta
    h = _silu(h)
    return h @ lin_w.T + lin_b


if __name__ == "__main__":
    B, F, O, ORDER = 64, 32, 16, 3
    H = F  # hidden_size == in_features
    key = jax.random.PRNGKey(0)
    kx, ka, kb, kp, klw, klb = jax.random.split(key, 6)

    x = jax.random.normal(kx, (B, F), jnp.float32)

    def kuni(k, shape, fan_in):
        bound = (3.0 / fan_in) ** 0.5
        return jax.random.uniform(k, shape, jnp.float32, -bound, bound)

    poly_w = kuni(kp, (H, F * (ORDER + 1)), F * (ORDER + 1))
    alpha_w = kuni(ka, (F, F), F)
    bias = kuni(kb, (F,), F)
    ln_gamma = jnp.ones((H,), jnp.float32)
    ln_beta = jnp.zeros((H,), jnp.float32)
    lin_w = kuni(klw, (O, H), H)
    lin_b = kuni(klb, (O,), H)

    ref = ggb_reference(x, alpha_w, bias, poly_w, ln_gamma, ln_beta,
                        lin_w, lin_b, polynomial_order=ORDER)

    # 1) f32-MXU path: bit-faithful, tight tolerance vs reference.
    out_f32 = ggb_linear_forward(x, alpha_w, bias, poly_w, ln_gamma, ln_beta,
                                 lin_w, lin_b, polynomial_order=ORDER,
                                 mxu_dtype=jnp.float32)
    out_f32 = jax.block_until_ready(out_f32)
    assert out_f32.shape == (B, O)
    assert jnp.allclose(out_f32, ref, rtol=1e-4, atol=1e-4), "f32 mismatch vs reference"

    # 2) bf16-at-the-MXU production path (bf16 output slab): loose validation.
    out_bf16 = ggb_linear_forward(x, alpha_w, bias, poly_w, ln_gamma, ln_beta,
                                  lin_w, lin_b, polynomial_order=ORDER,
                                  mxu_dtype=jnp.bfloat16)
    out_bf16 = jax.block_until_ready(out_bf16)
    assert out_bf16.shape == (B, O)
    rel = float(jnp.max(jnp.abs(out_bf16 - ref)) / (jnp.max(jnp.abs(ref)) + 1e-6))
    assert rel < 3e-2, f"bf16-MXU path deviates too much from f32 reference: {rel}"

    print("KERNEL_OK")
</pallas_src>

<mosaic_0001>
module attributes {stable_mosaic.version = 11 : i64} {
  func.func @ggb_kernel(%arg0: i32, %arg1: memref<1x2xf32, #tpu.memory_space<smem>>, %arg2: memref<32x32xf32, #tpu.memory_space<vmem>>, %arg3: memref<32x32xf32, #tpu.memory_space<vmem>>, %arg4: memref<32x32xf32, #tpu.memory_space<vmem>>, %arg5: memref<1x32xf32, #tpu.memory_space<vmem>>, %arg6: memref<128x32xf32, #tpu.memory_space<vmem>>, %arg7: memref<1x32xf32, #tpu.memory_space<vmem>>, %arg8: memref<1x32xf32, #tpu.memory_space<vmem>>, %arg9: memref<32x128xf32, #tpu.memory_space<vmem>>, %arg10: memref<1x128xf32, #tpu.memory_space<vmem>>, %arg11: memref<32x128xf32, #tpu.memory_space<vmem>>) attributes {dimension_semantics = [#tpu.dimension_semantics<parallel>], iteration_bounds = array<i64: 2>, scalar_prefetch = 0 : i64, scratch_operands = 0 : i64, tpu.core_type = #tpu.core_type<tc>, window_params = [{transform_indices = @transform_0, window_bounds = array<i64: 1, 2>}, {transform_indices = @transform_1, window_bounds = array<i64: 32, 32>}, {pipeline_mode = #tpu.pipeline_mode<synchronous>, transform_indices = @transform_2, window_bounds = array<i64: 32, 32>}, {pipeline_mode = #tpu.pipeline_mode<synchronous>, transform_indices = @transform_3, window_bounds = array<i64: 32, 32>}, {pipeline_mode = #tpu.pipeline_mode<synchronous>, transform_indices = @transform_4, window_bounds = array<i64: 1, 32>}, {pipeline_mode = #tpu.pipeline_mode<synchronous>, transform_indices = @transform_5, window_bounds = array<i64: 128, 32>}, {pipeline_mode = #tpu.pipeline_mode<synchronous>, transform_indices = @transform_6, window_bounds = array<i64: 1, 32>}, {pipeline_mode = #tpu.pipeline_mode<synchronous>, transform_indices = @transform_7, window_bounds = array<i64: 1, 32>}, {pipeline_mode = #tpu.pipeline_mode<synchronous>, transform_indices = @transform_8, window_bounds = array<i64: 32, 128>}, {pipeline_mode = #tpu.pipeline_mode<synchronous>, transform_indices = @transform_9, window_bounds = array<i64: 1, 128>}, {transform_indices = @transform_10, window_bounds = array<i64: 32, 128>}]} {
    %c0 = arith.constant 0 : index
    %c0_0 = arith.constant 0 : index
    %0 = vector.load %arg2[%c0, %c0_0] : memref<32x32xf32, #tpu.memory_space<vmem>>, vector<32x32xf32>
    %c0_1 = arith.constant 0 : index
    %c0_2 = arith.constant 0 : index
    %1 = memref.load %arg1[%c0_1, %c0_2] : memref<1x2xf32, #tpu.memory_space<smem>>
    %c0_3 = arith.constant 0 : index
    %c1 = arith.constant 1 : index
    %2 = memref.load %arg1[%c0_3, %c1] : memref<1x2xf32, #tpu.memory_space<smem>>
    %3 = vector.broadcast %1 : f32 to vector<32x32xf32>
    %4 = arith.mulf %0, %3 : vector<32x32xf32>
    %5 = vector.broadcast %2 : f32 to vector<32x32xf32>
    %6 = arith.addf %4, %5 : vector<32x32xf32>
    %c0_4 = arith.constant 0 : index
    %c0_5 = arith.constant 0 : index
    %7 = vector.load %arg3[%c0_4, %c0_5] : memref<32x32xf32, #tpu.memory_space<vmem>>, vector<32x32xf32>
    %c0_6 = arith.constant 0 : index
    %c0_7 = arith.constant 0 : index
    %8 = vector.load %arg4[%c0_6, %c0_7] : memref<32x32xf32, #tpu.memory_space<vmem>>, vector<32x32xf32>
    %cst = arith.constant 1.000000e+00 : f32
    %9 = vector.broadcast %cst : f32 to vector<32x32xf32>
    %c0_8 = arith.constant 0 : index
    %c0_9 = arith.constant 0 : index
    %10 = vector.load %arg6[%c0_8, %c0_9] : memref<128x32xf32, #tpu.memory_space<vmem>>, vector<32x32xf32>
    %cst_10 = arith.constant dense<0.000000e+00> : vector<32x32xf32>
    %11 = tpu.matmul %9, %10, %cst_10 {dimension_numbers = #tpu.dot_dimension_numbers<[1], [0], [0], [1], [0, 0, 1, 1], [], []>} : vector<32x32xf32>, vector<32x32xf32>, vector<32x32xf32> -> vector<32x32xf32>
    %cst_11 = arith.constant dense<0.000000e+00> : vector<32x32xf32>
    %12 = tpu.matmul %6, %8, %cst_11 {dimension_numbers = #tpu.dot_dimension_numbers<[1], [0], [0], [1], [0, 0, 1, 1], [], []>} : vector<32x32xf32>, vector<32x32xf32>, vector<32x32xf32> -> vector<32x32xf32>
    %c0_12 = arith.constant 0 : index
    %c0_13 = arith.constant 0 : index
    %13 = vector.load %arg5[%c0_12, %c0_13] : memref<1x32xf32, #tpu.memory_space<vmem>>, vector<1x32xf32>
    %14 = vector.broadcast %13 : vector<1x32xf32> to vector<32x32xf32>
    %15 = arith.addf %12, %14 : vector<32x32xf32>
    %cst_14 = arith.constant 2.000000e+00 : f32
    %16 = vector.broadcast %cst_14 : f32 to vector<32x32xf32>
    %17 = arith.mulf %16, %15 : vector<32x32xf32>
    %c32 = arith.constant 32 : index
    %c0_15 = arith.constant 0 : index
    %18 = vector.load %arg6[%c32, %c0_15] : memref<128x32xf32, #tpu.memory_space<vmem>>, vector<32x32xf32>
    %cst_16 = arith.constant dense<0.000000e+00> : vector<32x32xf32>
    %19 = tpu.matmul %17, %18, %cst_16 {dimension_numbers = #tpu.dot_dimension_numbers<[1], [0], [0], [1], [0, 0, 1, 1], [], []>} : vector<32x32xf32>, vector<32x32xf32>, vector<32x32xf32> -> vector<32x32xf32>
    %20 = arith.addf %11, %19 : vector<32x32xf32>
    %cst_17 = arith.constant 1.000000e+00 : f32
    %21 = vector.broadcast %cst_17 : f32 to vector<32x32xf32>
    %22 = arith.mulf %21, %6 : vector<32x32xf32>
    %23 = arith.addf %22, %12 : vector<32x32xf32>
    %cst_18 = arith.constant 2.000000e+00 : f32
    %24 = vector.broadcast %cst_18 : f32 to vector<32x32xf32>
    %25 = arith.mulf %24, %23 : vector<32x32xf32>
    %26 = arith.mulf %25, %17 : vector<32x32xf32>
    %cst_19 = arith.constant 0.000000e+00 : f32
    %27 = vector.broadcast %cst_19 : f32 to vector<32x32xf32>
    %28 = arith.mulf %27, %9 : vector<32x32xf32>
    %cst_20 = arith.constant dense<0.000000e+00> : vector<32x32xf32>
    %29 = tpu.matmul %9, %7, %cst_20 {dimension_numbers = #tpu.dot_dimension_numbers<[1], [0], [0], [1], [0, 0, 1, 1], [], []>} : vector<32x32xf32>, vector<32x32xf32>, vector<32x32xf32> -> vector<32x32xf32>
    %cst_21 = arith.constant 2.000000e+00 : f32
    %30 = vector.broadcast %cst_21 : f32 to vector<32x32xf32>
    %31 = arith.mulf %30, %29 : vector<32x32xf32>
    %32 = arith.addf %28, %31 : vector<32x32xf32>
    %33 = arith.subf %26, %32 : vector<32x32xf32>
    %cst_22 = arith.constant 2.000000e+00 : f32
    %34 = vector.broadcast %cst_22 : f32 to vector<32x32xf32>
    %35 = arith.divf %33, %34 : vector<32x32xf32>
    %c64 = arith.constant 64 : index
    %c0_23 = arith.constant 0 : index
    %36 = vector.load %arg6[%c64, %c0_23] : memref<128x32xf32, #tpu.memory_space<vmem>>, vector<32x32xf32>
    %cst_24 = arith.constant dense<0.000000e+00> : vector<32x32xf32>
    %37 = tpu.matmul %35, %36, %cst_24 {dimension_numbers = #tpu.dot_dimension_numbers<[1], [0], [0], [1], [0, 0, 1, 1], [], []>} : vector<32x32xf32>, vector<32x32xf32>, vector<32x32xf32> -> vector<32x32xf32>
    %38 = arith.addf %20, %37 : vector<32x32xf32>
    %cst_25 = arith.constant 2.000000e+00 : f32
    %39 = vector.broadcast %cst_25 : f32 to vector<32x32xf32>
    %40 = arith.mulf %39, %6 : vector<32x32xf32>
    %41 = arith.addf %40, %12 : vector<32x32xf32>
    %cst_26 = arith.constant 2.000000e+00 : f32
    %42 = vector.broadcast %cst_26 : f32 to vector<32x32xf32>
    %43 = arith.mulf %42, %41 : vector<32x32xf32>
    %44 = arith.mulf %43, %35 : vector<32x32xf32>
    %cst_27 = arith.constant 1.000000e+00 : f32
    %45 = vector.broadcast %cst_27 : f32 to vector<32x32xf32>
    %46 = arith.mulf %45, %17 : vector<32x32xf32>
    %cst_28 = arith.constant dense<0.000000e+00> : vector<32x32xf32>
    %47 = tpu.matmul %17, %7, %cst_28 {dimension_numbers = #tpu.dot_dimension_numbers<[1], [0], [0], [1], [0, 0, 1, 1], [], []>} : vector<32x32xf32>, vector<32x32xf32>, vector<32x32xf32> -> vector<32x32xf32>
    %cst_29 = arith.constant 2.000000e+00 : f32
    %48 = vector.broadcast %cst_29 : f32 to vector<32x32xf32>
    %49 = arith.mulf %48, %47 : vector<32x32xf32>
    %50 = arith.addf %46, %49 : vector<32x32xf32>
    %51 = arith.subf %44, %50 : vector<32x32xf32>
    %cst_30 = arith.constant 3.000000e+00 : f32
    %52 = vector.broadcast %cst_30 : f32 to vector<32x32xf32>
    %53 = arith.divf %51, %52 : vector<32x32xf32>
    %c96 = arith.constant 96 : index
    %c0_31 = arith.constant 0 : index
    %54 = vector.load %arg6[%c96, %c0_31] : memref<128x32xf32, #tpu.memory_space<vmem>>, vector<32x32xf32>
    %cst_32 = arith.constant dense<0.000000e+00> : vector<32x32xf32>
    %55 = tpu.matmul %53, %54, %cst_32 {dimension_numbers = #tpu.dot_dimension_numbers<[1], [0], [0], [1], [0, 0, 1, 1], [], []>} : vector<32x32xf32>, vector<32x32xf32>, vector<32x32xf32> -> vector<32x32xf32>
    %56 = arith.addf %38, %55 : vector<32x32xf32>
    %cst_33 = arith.constant dense<0.000000e+00> : vector<32xf32>
    %57 = vector.multi_reduction <add>, %56, %cst_33 [1] : vector<32x32xf32> to vector<32xf32>
    %58 = vector.shape_cast %57 : vector<32xf32> to vector<32x1xf32>
    %cst_34 = arith.constant 3.125000e-02 : f32
    %59 = vector.broadcast %cst_34 : f32 to vector<32x1xf32>
    %60 = arith.mulf %58, %59 : vector<32x1xf32>
    %61 = arith.mulf %56, %56 : vector<32x32xf32>
    %cst_35 = arith.constant dense<0.000000e+00> : vector<32xf32>
    %62 = vector.multi_reduction <add>, %61, %cst_35 [1] : vector<32x32xf32> to vector<32xf32>
    %63 = vector.shape_cast %62 : vector<32xf32> to vector<32x1xf32>
    %cst_36 = arith.constant 3.125000e-02 : f32
    %64 = vector.broadcast %cst_36 : f32 to vector<32x1xf32>
    %65 = arith.mulf %63, %64 : vector<32x1xf32>
    %66 = arith.mulf %60, %60 : vector<32x1xf32>
    %67 = arith.subf %65, %66 : vector<32x1xf32>
    %68 = vector.broadcast %60 : vector<32x1xf32> to vector<32x32xf32>
    %69 = arith.subf %56, %68 : vector<32x32xf32>
    %cst_37 = arith.constant 9.99999974E-6 : f32
    %70 = vector.broadcast %cst_37 : f32 to vector<32x1xf32>
    %71 = arith.addf %67, %70 : vector<32x1xf32>
    %72 = math.rsqrt %71 : vector<32x1xf32>
    %73 = vector.broadcast %72 : vector<32x1xf32> to vector<32x32xf32>
    %74 = arith.mulf %69, %73 : vector<32x32xf32>
    %c0_38 = arith.constant 0 : index
    %c0_39 = arith.constant 0 : index
    %75 = vector.load %arg7[%c0_38, %c0_39] : memref<1x32xf32, #tpu.memory_space<vmem>>, vector<1x32xf32>
    %76 = vector.broadcast %75 : vector<1x32xf32> to vector<32x32xf32>
    %77 = arith.mulf %74, %76 : vector<32x32xf32>
    %c0_40 = arith.constant 0 : index
    %c0_41 = arith.constant 0 : index
    %78 = vector.load %arg8[%c0_40, %c0_41] : memref<1x32xf32, #tpu.memory_space<vmem>>, vector<1x32xf32>
    %79 = vector.broadcast %78 : vector<1x32xf32> to vector<32x32xf32>
    %80 = arith.addf %77, %79 : vector<32x32xf32>
    %81 = arith.negf %80 : vector<32x32xf32>
    %82 = math.exp %81 : vector<32x32xf32>
    %cst_42 = arith.constant 1.000000e+00 : f32
    %83 = vector.broadcast %cst_42 : f32 to vector<32x32xf32>
    %84 = arith.addf %83, %82 : vector<32x32xf32>
    %85 = arith.divf %83, %84 : vector<32x32xf32>
    %86 = arith.mulf %80, %85 : vector<32x32xf32>
    %c0_43 = arith.constant 0 : index
    %c0_44 = arith.constant 0 : index
    %87 = vector.load %arg9[%c0_43, %c0_44] : memref<32x128xf32, #tpu.memory_space<vmem>>, vector<32x128xf32>
    %cst_45 = arith.constant dense<0.000000e+00> : vector<32x128xf32>
    %88 = tpu.matmul %86, %87, %cst_45 {dimension_numbers = #tpu.dot_dimension_numbers<[1], [0], [0], [1], [0, 0, 1, 1], [], []>} : vector<32x32xf32>, vector<32x128xf32>, vector<32x128xf32> -> vector<32x128xf32>
    %c0_46 = arith.constant 0 : index
    %c0_47 = arith.constant 0 : index
    %89 = vector.load %arg10[%c0_46, %c0_47] : memref<1x128xf32, #tpu.memory_space<vmem>>, vector<1x128xf32>
    %90 = vector.broadcast %89 : vector<1x128xf32> to vector<32x128xf32>
    %91 = arith.addf %88, %90 : vector<32x128xf32>
    %c0_48 = arith.constant 0 : index
    %c0_49 = arith.constant 0 : index
    %92 = vector.load %arg11[%c0_48, %c0_49] : memref<32x128xf32, #tpu.memory_space<vmem>>, vector<32x128xf32>
    tpu.vector_store %arg11[%c0_48, %c0_49], %91 {strides = array<i32>} : memref<32x128xf32, #tpu.memory_space<vmem>>, vector<32x128xf32>,
    return
  }
  func.func @transform_0(%arg0: i32) -> (i32, i32) {
    %c0_i32 = arith.constant 0 : i32
    %c0_i32_0 = arith.constant 0 : i32
    %c0_i32_1 = arith.constant 0 : i32
    return %c0_i32, %c0_i32_0 : i32, i32
  }
  func.func @transform_1(%arg0: i32) -> (i32, i32) {
    %c0_i32 = arith.constant 0 : i32
    %c0_i32_0 = arith.constant 0 : i32
    return %arg0, %c0_i32 : i32, i32
  }
  func.func @transform_2(%arg0: i32) -> (i32, i32) {
    %c0_i32 = arith.constant 0 : i32
    %c0_i32_0 = arith.constant 0 : i32
    %c0_i32_1 = arith.constant 0 : i32
    return %c0_i32, %c0_i32_0 : i32, i32
  }
  func.func @transform_3(%arg0: i32) -> (i32, i32) {
    %c0_i32 = arith.constant 0 : i32
    %c0_i32_0 = arith.constant 0 : i32
    %c0_i32_1 = arith.constant 0 : i32
    return %c0_i32, %c0_i32_0 : i32, i32
  }
  func.func @transform_4(%arg0: i32) -> (i32, i32) {
    %c0_i32 = arith.constant 0 : i32
    %c0_i32_0 = arith.constant 0 : i32
    %c0_i32_1 = arith.constant 0 : i32
    return %c0_i32, %c0_i32_0 : i32, i32
  }
  func.func @transform_5(%arg0: i32) -> (i32, i32) {
    %c0_i32 = arith.constant 0 : i32
    %c0_i32_0 = arith.constant 0 : i32
    %c0_i32_1 = arith.constant 0 : i32
    return %c0_i32, %c0_i32_0 : i32, i32
  }
  func.func @transform_6(%arg0: i32) -> (i32, i32) {
    %c0_i32 = arith.constant 0 : i32
    %c0_i32_0 = arith.constant 0 : i32
    %c0_i32_1 = arith.constant 0 : i32
    return %c0_i32, %c0_i32_0 : i32, i32
  }
  func.func @transform_7(%arg0: i32) -> (i32, i32) {
    %c0_i32 = arith.constant 0 : i32
    %c0_i32_0 = arith.constant 0 : i32
    %c0_i32_1 = arith.constant 0 : i32
    return %c0_i32, %c0_i32_0 : i32, i32
  }
  func.func @transform_8(%arg0: i32) -> (i32, i32) {
    %c0_i32 = arith.constant 0 : i32
    %c0_i32_0 = arith.constant 0 : i32
    %c0_i32_1 = arith.constant 0 : i32
    return %c0_i32, %c0_i32_0 : i32, i32
  }
  func.func @transform_9(%arg0: i32) -> (i32, i32) {
    %c0_i32 = arith.constant 0 : i32
    %c0_i32_0 = arith.constant 0 : i32
    %c0_i32_1 = arith.constant 0 : i32
    return %c0_i32, %c0_i32_0 : i32, i32
  }
  func.func @transform_10(%arg0: i32) -> (i32, i32) {
    %c0_i32 = arith.constant 0 : i32
    %c0_i32_0 = arith.constant 0 : i32
    return %arg0, %c0_i32 : i32, i32
  }
}

module attributes {stable_mosaic.version = 11 : i64} {
  func.func @ggb_kernel(%arg0: i32, %arg1: memref<1x2xf32, #tpu.memory_space<smem>>, %arg2: memref<32x32xf32, #tpu.memory_space<vmem>>, %arg3: memref<32x32xf32, #tpu.memory_space<vmem>>, %arg4: memref<32x32xf32, #tpu.memory_space<vmem>>, %arg5: memref<1x32xf32, #tpu.memory_space<vmem>>, %arg6: memref<128x32xf32, #tpu.memory_space<vmem>>, %arg7: memref<1x32xf32, #tpu.memory_space<vmem>>, %arg8: memref<1x32xf32, #tpu.memory_space<vmem>>, %arg9: memref<32x128xf32, #tpu.memory_space<vmem>>, %arg10: memref<1x128xf32, #tpu.memory_space<vmem>>, %arg11: memref<32x128xf32, #tpu.memory_space<vmem>>) attributes {dimension_semantics = [#tpu.dimension_semantics<parallel>], iteration_bounds = array<i64: 2>, scalar_prefetch = 0 : i64, scratch_operands = 0 : i64, tpu.core_type = #tpu.core_type<tc>, window_params = [{transform_indices = @transform_0, window_bounds = array<i64: 1, 2>}, {transform_indices = @transform_1, window_bounds = array<i64: 32, 32>}, {pipeline_mode = #tpu.pipeline_mode<synchronous>, transform_indices = @transform_2, window_bounds = array<i64: 32, 32>}, {pipeline_mode = #tpu.pipeline_mode<synchronous>, transform_indices = @transform_3, window_bounds = array<i64: 32, 32>}, {pipeline_mode = #tpu.pipeline_mode<synchronous>, transform_indices = @transform_4, window_bounds = array<i64: 1, 32>}, {pipeline_mode = #tpu.pipeline_mode<synchronous>, transform_indices = @transform_5, window_bounds = array<i64: 128, 32>}, {pipeline_mode = #tpu.pipeline_mode<synchronous>, transform_indices = @transform_6, window_bounds = array<i64: 1, 32>}, {pipeline_mode = #tpu.pipeline_mode<synchronous>, transform_indices = @transform_7, window_bounds = array<i64: 1, 32>}, {pipeline_mode = #tpu.pipeline_mode<synchronous>, transform_indices = @transform_8, window_bounds = array<i64: 32, 128>}, {pipeline_mode = #tpu.pipeline_mode<synchronous>, transform_indices = @transform_9, window_bounds = array<i64: 1, 128>}, {transform_indices = @transform_10, window_bounds = array<i64: 32, 128>}]} {
    %c0 = arith.constant 0 : index
    %c0_0 = arith.constant 0 : index
    %0 = vector.load %arg2[%c0, %c0_0] : memref<32x32xf32, #tpu.memory_space<vmem>>, vector<32x32xf32>
    %c0_1 = arith.constant 0 : index
    %c0_2 = arith.constant 0 : index
    %1 = memref.load %arg1[%c0_1, %c0_2] : memref<1x2xf32, #tpu.memory_space<smem>>
    %c0_3 = arith.constant 0 : index
    %c1 = arith.constant 1 : index
    %2 = memref.load %arg1[%c0_3, %c1] : memref<1x2xf32, #tpu.memory_space<smem>>
    %3 = vector.broadcast %1 : f32 to vector<32x32xf32>
    %4 = arith.mulf %0, %3 : vector<32x32xf32>
    %5 = vector.broadcast %2 : f32 to vector<32x32xf32>
    %6 = arith.addf %4, %5 : vector<32x32xf32>
    %c0_4 = arith.constant 0 : index
    %c0_5 = arith.constant 0 : index
    %7 = vector.load %arg3[%c0_4, %c0_5] : memref<32x32xf32, #tpu.memory_space<vmem>>, vector<32x32xf32>
    %c0_6 = arith.constant 0 : index
    %c0_7 = arith.constant 0 : index
    %8 = vector.load %arg4[%c0_6, %c0_7] : memref<32x32xf32, #tpu.memory_space<vmem>>, vector<32x32xf32>
    %cst = arith.constant 1.000000e+00 : f32
    %9 = vector.broadcast %cst : f32 to vector<32x32xf32>
    %c0_8 = arith.constant 0 : index
    %c0_9 = arith.constant 0 : index
    %10 = vector.load %arg6[%c0_8, %c0_9] : memref<128x32xf32, #tpu.memory_space<vmem>>, vector<32x32xf32>
    %cst_10 = arith.constant dense<0.000000e+00> : vector<32x32xf32>
    %11 = tpu.matmul %9, %10, %cst_10 {dimension_numbers = #tpu.dot_dimension_numbers<[1], [0], [0], [1], [0, 0, 1, 1], [], []>} : vector<32x32xf32>, vector<32x32xf32>, vector<32x32xf32> -> vector<32x32xf32>
    %cst_11 = arith.constant dense<0.000000e+00> : vector<32x32xf32>
    %12 = tpu.matmul %6, %8, %cst_11 {dimension_numbers = #tpu.dot_dimension_numbers<[1], [0], [0], [1], [0, 0, 1, 1], [], []>} : vector<32x32xf32>, vector<32x32xf32>, vector<32x32xf32> -> vector<32x32xf32>
    %c0_12 = arith.constant 0 : index
    %c0_13 = arith.constant 0 : index
    %13 = vector.load %arg5[%c0_12, %c0_13] : memref<1x32xf32, #tpu.memory_space<vmem>>, vector<1x32xf32>
    %14 = vector.broadcast %13 : vector<1x32xf32> to vector<32x32xf32>
    %15 = arith.addf %12, %14 : vector<32x32xf32>
    %cst_14 = arith.constant 2.000000e+00 : f32
    %16 = vector.broadcast %cst_14 : f32 to vector<32x32xf32>
    %17 = arith.mulf %16, %15 : vector<32x32xf32>
    %c32 = arith.constant 32 : index
    %c0_15 = arith.constant 0 : index
    %18 = vector.load %arg6[%c32, %c0_15] : memref<128x32xf32, #tpu.memory_space<vmem>>, vector<32x32xf32>
    %cst_16 = arith.constant dense<0.000000e+00> : vector<32x32xf32>
    %19 = tpu.matmul %17, %18, %cst_16 {dimension_numbers = #tpu.dot_dimension_numbers<[1], [0], [0], [1], [0, 0, 1, 1], [], []>} : vector<32x32xf32>, vector<32x32xf32>, vector<32x32xf32> -> vector<32x32xf32>
    %20 = arith.addf %11, %19 : vector<32x32xf32>
    %cst_17 = arith.constant 1.000000e+00 : f32
    %21 = vector.broadcast %cst_17 : f32 to vector<32x32xf32>
    %22 = arith.mulf %21, %6 : vector<32x32xf32>
    %23 = arith.addf %22, %12 : vector<32x32xf32>
    %cst_18 = arith.constant 2.000000e+00 : f32
    %24 = vector.broadcast %cst_18 : f32 to vector<32x32xf32>
    %25 = arith.mulf %24, %23 : vector<32x32xf32>
    %26 = arith.mulf %25, %17 : vector<32x32xf32>
    %cst_19 = arith.constant 0.000000e+00 : f32
    %27 = vector.broadcast %cst_19 : f32 to vector<32x32xf32>
    %28 = arith.mulf %27, %9 : vector<32x32xf32>
    %cst_20 = arith.constant dense<0.000000e+00> : vector<32x32xf32>
    %29 = tpu.matmul %9, %7, %cst_20 {dimension_numbers = #tpu.dot_dimension_numbers<[1], [0], [0], [1], [0, 0, 1, 1], [], []>} : vector<32x32xf32>, vector<32x32xf32>, vector<32x32xf32> -> vector<32x32xf32>
    %cst_21 = arith.constant 2.000000e+00 : f32
    %30 = vector.broadcast %cst_21 : f32 to vector<32x32xf32>
    %31 = arith.mulf %30, %29 : vector<32x32xf32>
    %32 = arith.addf %28, %31 : vector<32x32xf32>
    %33 = arith.subf %26, %32 : vector<32x32xf32>
    %cst_22 = arith.constant 2.000000e+00 : f32
    %34 = vector.broadcast %cst_22 : f32 to vector<32x32xf32>
    %35 = arith.divf %33, %34 : vector<32x32xf32>
    %c64 = arith.constant 64 : index
    %c0_23 = arith.constant 0 : index
    %36 = vector.load %arg6[%c64, %c0_23] : memref<128x32xf32, #tpu.memory_space<vmem>>, vector<32x32xf32>
    %cst_24 = arith.constant dense<0.000000e+00> : vector<32x32xf32>
    %37 = tpu.matmul %35, %36, %cst_24 {dimension_numbers = #tpu.dot_dimension_numbers<[1], [0], [0], [1], [0, 0, 1, 1], [], []>} : vector<32x32xf32>, vector<32x32xf32>, vector<32x32xf32> -> vector<32x32xf32>
    %38 = arith.addf %20, %37 : vector<32x32xf32>
    %cst_25 = arith.constant 2.000000e+00 : f32
    %39 = vector.broadcast %cst_25 : f32 to vector<32x32xf32>
    %40 = arith.mulf %39, %6 : vector<32x32xf32>
    %41 = arith.addf %40, %12 : vector<32x32xf32>
    %cst_26 = arith.constant 2.000000e+00 : f32
    %42 = vector.broadcast %cst_26 : f32 to vector<32x32xf32>
    %43 = arith.mulf %42, %41 : vector<32x32xf32>
    %44 = arith.mulf %43, %35 : vector<32x32xf32>
    %cst_27 = arith.constant 1.000000e+00 : f32
    %45 = vector.broadcast %cst_27 : f32 to vector<32x32xf32>
    %46 = arith.mulf %45, %17 : vector<32x32xf32>
    %cst_28 = arith.constant dense<0.000000e+00> : vector<32x32xf32>
    %47 = tpu.matmul %17, %7, %cst_28 {dimension_numbers = #tpu.dot_dimension_numbers<[1], [0], [0], [1], [0, 0, 1, 1], [], []>} : vector<32x32xf32>, vector<32x32xf32>, vector<32x32xf32> -> vector<32x32xf32>
    %cst_29 = arith.constant 2.000000e+00 : f32
    %48 = vector.broadcast %cst_29 : f32 to vector<32x32xf32>
    %49 = arith.mulf %48, %47 : vector<32x32xf32>
    %50 = arith.addf %46, %49 : vector<32x32xf32>
    %51 = arith.subf %44, %50 : vector<32x32xf32>
    %cst_30 = arith.constant 3.000000e+00 : f32
    %52 = vector.broadcast %cst_30 : f32 to vector<32x32xf32>
    %53 = arith.divf %51, %52 : vector<32x32xf32>
    %c96 = arith.constant 96 : index
    %c0_31 = arith.constant 0 : index
    %54 = vector.load %arg6[%c96, %c0_31] : memref<128x32xf32, #tpu.memory_space<vmem>>, vector<32x32xf32>
    %cst_32 = arith.constant dense<0.000000e+00> : vector<32x32xf32>
    %55 = tpu.matmul %53, %54, %cst_32 {dimension_numbers = #tpu.dot_dimension_numbers<[1], [0], [0], [1], [0, 0, 1, 1], [], []>} : vector<32x32xf32>, vector<32x32xf32>, vector<32x32xf32> -> vector<32x32xf32>
    %56 = arith.addf %38, %55 : vector<32x32xf32>
    %cst_33 = arith.constant dense<0.000000e+00> : vector<32xf32>
    %57 = vector.multi_reduction <add>, %56, %cst_33 [1] : vector<32x32xf32> to vector<32xf32>
    %58 = vector.shape_cast %57 : vector<32xf32> to vector<32x1xf32>
    %cst_34 = arith.constant 3.125000e-02 : f32
    %59 = vector.broadcast %cst_34 : f32 to vector<32x1xf32>
    %60 = arith.mulf %58, %59 : vector<32x1xf32>
    %61 = arith.mulf %56, %56 : vector<32x32xf32>
    %cst_35 = arith.constant dense<0.000000e+00> : vector<32xf32>
    %62 = vector.multi_reduction <add>, %61, %cst_35 [1] : vector<32x32xf32> to vector<32xf32>
    %63 = vector.shape_cast %62 : vector<32xf32> to vector<32x1xf32>
    %cst_36 = arith.constant 3.125000e-02 : f32
    %64 = vector.broadcast %cst_36 : f32 to vector<32x1xf32>
    %65 = arith.mulf %63, %64 : vector<32x1xf32>
    %66 = arith.mulf %60, %60 : vector<32x1xf32>
    %67 = arith.subf %65, %66 : vector<32x1xf32>
    %68 = vector.broadcast %60 : vector<32x1xf32> to vector<32x32xf32>
    %69 = arith.subf %56, %68 : vector<32x32xf32>
    %cst_37 = arith.constant 9.99999974E-6 : f32
    %70 = vector.broadcast %cst_37 : f32 to vector<32x1xf32>
    %71 = arith.addf %67, %70 : vector<32x1xf32>
    %72 = math.rsqrt %71 : vector<32x1xf32>
    %73 = vector.broadcast %72 : vector<32x1xf32> to vector<32x32xf32>
    %74 = arith.mulf %69, %73 : vector<32x32xf32>
    %c0_38 = arith.constant 0 : index
    %c0_39 = arith.constant 0 : index
    %75 = vector.load %arg7[%c0_38, %c0_39] : memref<1x32xf32, #tpu.memory_space<vmem>>, vector<1x32xf32>
    %76 = vector.broadcast %75 : vector<1x32xf32> to vector<32x32xf32>
    %77 = arith.mulf %74, %76 : vector<32x32xf32>
    %c0_40 = arith.constant 0 : index
    %c0_41 = arith.constant 0 : index
    %78 = vector.load %arg8[%c0_40, %c0_41] : memref<1x32xf32, #tpu.memory_space<vmem>>, vector<1x32xf32>
    %79 = vector.broadcast %78 : vector<1x32xf32> to vector<32x32xf32>
    %80 = arith.addf %77, %79 : vector<32x32xf32>
    %81 = arith.negf %80 : vector<32x32xf32>
    %82 = math.exp %81 : vector<32x32xf32>
    %cst_42 = arith.constant 1.000000e+00 : f32
    %83 = vector.broadcast %cst_42 : f32 to vector<32x32xf32>
    %84 = arith.addf %83, %82 : vector<32x32xf32>
    %85 = arith.divf %83, %84 : vector<32x32xf32>
    %86 = arith.mulf %80, %85 : vector<32x32xf32>
    %c0_43 = arith.constant 0 : index
    %c0_44 = arith.constant 0 : index
    %87 = vector.load %arg9[%c0_43, %c0_44] : memref<32x128xf32, #tpu.memory_space<vmem>>, vector<32x128xf32>
    %cst_45 = arith.constant dense<0.000000e+00> : vector<32x128xf32>
    %88 = tpu.matmul %86, %87, %cst_45 {dimension_numbers = #tpu.dot_dimension_numbers<[1], [0], [0], [1], [0, 0, 1, 1], [], []>} : vector<32x32xf32>, vector<32x128xf32>, vector<32x128xf32> -> vector<32x128xf32>
    %c0_46 = arith.constant 0 : index
    %c0_47 = arith.constant 0 : index
    %89 = vector.load %arg10[%c0_46, %c0_47] : memref<1x128xf32, #tpu.memory_space<vmem>>, vector<1x128xf32>
    %90 = vector.broadcast %89 : vector<1x128xf32> to vector<32x128xf32>
    %91 = arith.addf %88, %90 : vector<32x128xf32>
    %c0_48 = arith.constant 0 : index
    %c0_49 = arith.constant 0 : index
    %92 = vector.load %arg11[%c0_48, %c0_49] : memref<32x128xf32, #tpu.memory_space<vmem>>, vector<32x128xf32>
    tpu.vector_store %arg11[%c0_48, %c0_49], %91 {strides = array<i32>} : memref<32x128xf32, #tpu.memory_space<vmem>>, vector<32x128xf32>,
    return
  }
  func.func @transform_0(%arg0: i32) -> (i32, i32) {
    %c0_i32 = arith.constant 0 : i32
    %c0_i32_0 = arith.constant 0 : i32
    %c0_i32_1 = arith.constant 0 : i32
    return %c0_i32, %c0_i32_0 : i32, i32
  }
  func.func @transform_1(%arg0: i32) -> (i32, i32) {
    %c0_i32 = arith.constant 0 : i32
    %c0_i32_0 = arith.constant 0 : i32
    return %arg0, %c0_i32 : i32, i32
  }
  func.func @transform_2(%arg0: i32) -> (i32, i32) {
    %c0_i32 = arith.constant 0 : i32
    %c0_i32_0 = arith.constant 0 : i32
    %c0_i32_1 = arith.constant 0 : i32
    return %c0_i32, %c0_i32_0 : i32, i32
  }
  func.func @transform_3(%arg0: i32) -> (i32, i32) {
    %c0_i32 = arith.constant 0 : i32
    %c0_i32_0 = arith.constant 0 : i32
    %c0_i32_1 = arith.constant 0 : i32
    return %c0_i32, %c0_i32_0 : i32, i32
  }
  func.func @transform_4(%arg0: i32) -> (i32, i32) {
    %c0_i32 = arith.constant 0 : i32
    %c0_i32_0 = arith.constant 0 : i32
    %c0_i32_1 = arith.constant 0 : i32
    return %c0_i32, %c0_i32_0 : i32, i32
  }
  func.func @transform_5(%arg0: i32) -> (i32, i32) {
    %c0_i32 = arith.constant 0 : i32
    %c0_i32_0 = arith.constant 0 : i32
    %c0_i32_1 = arith.constant 0 : i32
    return %c0_i32, %c0_i32_0 : i32, i32
  }
  func.func @transform_6(%arg0: i32) -> (i32, i32) {
    %c0_i32 = arith.constant 0 : i32
    %c0_i32_0 = arith.constant 0 : i32
    %c0_i32_1 = arith.constant 0 : i32
    return %c0_i32, %c0_i32_0 : i32, i32
  }
  func.func @transform_7(%arg0: i32) -> (i32, i32) {
    %c0_i32 = arith.constant 0 : i32
    %c0_i32_0 = arith.constant 0 : i32
    %c0_i32_1 = arith.constant 0 : i32
    return %c0_i32, %c0_i32_0 : i32, i32
  }
  func.func @transform_8(%arg0: i32) -> (i32, i32) {
    %c0_i32 = arith.constant 0 : i32
    %c0_i32_0 = arith.constant 0 : i32
    %c0_i32_1 = arith.constant 0 : i32
    return %c0_i32, %c0_i32_0 : i32, i32
  }
  func.func @transform_9(%arg0: i32) -> (i32, i32) {
    %c0_i32 = arith.constant 0 : i32
    %c0_i32_0 = arith.constant 0 : i32
    %c0_i32_1 = arith.constant 0 : i32
    return %c0_i32, %c0_i32_0 : i32, i32
  }
  func.func @transform_10(%arg0: i32) -> (i32, i32) {
    %c0_i32 = arith.constant 0 : i32
    %c0_i32_0 = arith.constant 0 : i32
    return %arg0, %c0_i32 : i32, i32
  }
}

</mosaic_0001>

<bundles_post_ra>
// kernel: tpu_custom_call.1
= control target key start
LH: loop header
LB: loop body
LE: loop exit
PB: predicated region body
PF: predicated region fallthrough
CT: control target
= control target key end

     0   :  { %s2302_s0 = inlined_call_operand.vmem [shape: f32[1,2], index: 0, kind: input, shape index: {}]   ;;  %s2303_s1 = inlined_call_operand.vmem [shape: f32[64,32], index: 1, kind: input, shape index: {}]   ;;  %s2304_s2 = inlined_call_operand.vmem [shape: f32[32,32], index: 2, kind: input, shape index: {}]   ;;  %s2305_s3 = inlined_call_operand.vmem [shape: f32[32,32], index: 3, kind: input, shape index: {}]   ;;  %s2306_s4 = inlined_call_operand.vmem [shape: f32[1,32], index: 4, kind: input, shape index: {}]   ;;  %s2307_s5 = inlined_call_operand.vmem [shape: f32[128,32], index: 5, kind: input, shape index: {}]   ;;  %s2308_s6 = inlined_call_operand.vmem [shape: f32[1,32], index: 6, kind: input, shape index: {}]   ;;  %s2309_s7 = inlined_call_operand.vmem [shape: f32[1,32], index: 7, kind: input, shape index: {}]   ;;  %s2310_s8 = inlined_call_operand.vmem [shape: f32[32,128], index: 8, kind: input, shape index: {}]   ;;  %s2311_s9 = inlined_call_operand.vmem [shape: f32[1,128], index: 9, kind: input, shape index: {}]   ;;  %s2312_s10 = inlined_call_operand.hbm [shape: f32[64,128], index: 10, kind: output, shape index: {}]  }
   0x1   :  { %2313 = sst [smem:[#allocation8_spill]] %s2302_s0 }
   0x2   :  { %15 = vsyncpa [#allocation4], 0 }
   0x3   :  { %16 = vsyncpa [#allocation3], 0 }
   0x4   :  { %18 = vsyncpa [#allocation3 + $0x1], 0  ;;  %s1985_s13 = smov 0   ;;  %s1987_s14 = smov 0  }
   0x5   :  { %s1989_s15 = smov 0   ;;  %s1991_s16 = smov 0  }
   0x6 LB: > { %s2006_s17 = sadd.s32 4294967295, %s1923_s16   ;;  %s1457_s18 = sadd.s32 4294967294, %s1923_s16   ;;  %s1923_s16 = sphi %s1991_s16, %s2321_s16   ;;  %s1919_s15 = sphi %s1989_s15, %s2320_s15   ;;  %s1915_s14 = sphi %s1987_s14, %s2319_s14   ;;  %s1911_s13 = sphi %s1985_s13, %s2318_s13  }
   0x7   : > { %s2010_s19 = sadd.s32 1, %s1923_s16   ;;  %s246_s20 = sadd.s32 1, %s1919_s15 }
   0x8   : > { %s243_s21 = ssub.s32 %s1923_s16, %s2010_s19  ;;  %p256_p0 = scmp.ne.s32.totalorder %s1919_s15, %s1915_s14 }
   0x9   : > { %p244_p1 = scmp.eq.s32.totalorder %s243_s21, 0  ;;  %p257_p2 = scmp.eq.s32.totalorder %s2006_s17, 1 }
   0xa   : > { %p262_p3 = scmp.ne.s32.totalorder %s1915_s14, %s1911_s13  ;;  %p263_p4 = scmp.eq.s32.totalorder %s1457_s18, 1 }
   0xb   : > { %s2021_s22 = scalar_select %p244_p1, %s1919_s15, %s246_s20  }
   0xc   : > { %p2023_p5 = por %p257_p2, %p256_p0  ;;  %p2027_p6 = por %p263_p4, %p262_p3 }
   0xd   : > { %p1458_p7 = scmp.ge.s32.totalorder %s1923_s16, 1  ;;  %p270_p8 = scmp.lt.s32.totalorder %s1923_s16, 3 }
   0xe   : > { %p1779_p9 = scmp.eq.s32.totalorder %s2006_s17, 0  ;;  %s2317_s0 = sld [smem:[#allocation8_spill]] }
   0xf   : > { %p2034_p10 = pnand %p1458_p7, %p270_p8 }
  0x11   : > { %p1771_p11 = pneg %p2034_p10 }
  0x13   : > { %p1772_p12 = pnand %p1779_p9, %p1771_p11 }
  0x14   : > { %s283_s28 = sshll.u32 %s2317_s0, 4  ;;  %s284_s28 = int_to_ptr.vmem [resolvable:$true] %s283_s28 }
  0x15   : > { %s1842_s29 = scalar_lea.vmem %s284_s28, 16  ;;  %p1844_p0 = pneg %p1772_p12 }
  0x16   : > { %p1843_p13 = scmp.ne.s32.totalorder %s284_s28, %s1842_s29  ;;  %p1850_p3 = scmp.lt.s32.totalorder %s284_s28, %s284_s28 }
  0x17   : > { %p1851_p4 = scmp.lt.s32.totalorder %s1842_s29, %s1842_s29 }
  0x18   : > { %p1845_p1 = pnand %p1844_p0, %p1843_p13 }
  0x19   : > { %p1852_p7 = por %p1851_p4, %p1850_p3 }
  0x1a   : > { %p1846_p2 = pneg %p1845_p1 }
  0x1c   : > { %p1853_p8 = pnand %p1852_p7, %p1846_p2 }
  0x1e   : > { %1856 = shalt.err (!%p1853_p8)
}
  0x1f   : > { %s1925_s30 = smov [#allocation2]   ;;  %329 = sbr.rel (%p2034_p10) target bundleno = 1143 (0x477), region = 60 }
  0x20   : > { %1774 = dma.vmem_to_smem (!%p1772_p12), %s284_s28, 16, %s1925_s30, [#allocation4]  }
  0x26   : > { %1902 = dma.done.wait (%p1779_p9), [#allocation4], 16  }
  0x27   : > { %1904 = vsyncadd (%p1779_p9), [#allocation4], 4294967280 }
  0x28   : > { %335 = sfence }
  0x29   : > { %v395_v0 = vld [vmem:[%s2305_s3] sm:$0xff]  ;;  %v396_v1 = vld [vmem:[%s2305_s3 + $0x8] sm:$0xff]  ;;  %v397_v2 = vld [vmem:[%s2305_s3 + $0x10] sm:$0xff]  ;;  %s1464_s25 = sshll.u32 %s2006_s17, 2  ;;  %s379_s27 = sld [smem:[#allocation2]]  ;;  %vm403_vm0 = vcmask 261120  }
  0x2a   : > { %v1689_v3 = vpack.c.bf16 %v396_v1, %v395_v0  ;;  %v398_v4 = vld [vmem:[%s2305_s3 + $0x18] sm:$0xff]  ;;  %p369_p9 = scmp.lt.s32.totalorder %s1464_s25, 7  ;;  %s1466_s30 = sld [smem:[#allocation2 + $0x1]]  ;;  %v391_v6 = vld [vmem:[%s2304_s2] sm:$0xff]  ;;  %v392_v7 = vld [vmem:[%s2304_s2 + $0x8] sm:$0xff]  ;;  %v1926_v29 = vmov 1.0  }
  0x2b   : > { %v1693_v5 = vpack.c.bf16 %v398_v4, %v397_v2  ;;  %v516_v8 = vld [vmem:[%s2307_s5 + $0x20] sm:$0xff]  ;;  %v517_v9 = vld [vmem:[%s2307_s5 + $0x28] sm:$0xff]  ;;  %v1713_v11 = vpack.c.bf16 %v392_v7, %v391_v6  ;;  %v393_v21 = vld [vmem:[%s2304_s2 + $0x10] sm:$0xff]  ;;  %s365_s12 = sand.u32 1, %s1915_s14  }
  0x2c   : > { %1690 = vmatprep.subr.bf16.mxu0 %v1689_v3  ;;  %s2323_s25 = smov (!%p369_p9, %s1464_s25), 7  ;;  %v1697_v10 = vpack.c.bf16 %v517_v9, %v516_v8  ;;  %v394_v22 = vld [vmem:[%s2304_s2 + $0x18] sm:$0xff]  ;;  %v518_v30 = vld [vmem:[%s2307_s5 + $0x30] sm:$0xff]  ;;  %v399_v33 = vld [vmem:[%s2307_s5] sm:$0xff] }
  0x2d   : > { %1692 = vmatpush3.bf16.msra.mxu0 %v1689_v3  ;;  %s1465_s29 = sshll.u32 %s2323_s25, 3  ;;  %v1717_v27 = vpack.c.bf16 %v394_v22, %v393_v21  ;;  %v519_v31 = vld [vmem:[%s2307_s5 + $0x38] sm:$0xff]  ;;  %v400_v34 = vld [vmem:[%s2307_s5 + $0x8] sm:$0xff]  ;;  %v1471_v36 = vld [vmem:[%s2306_s4] ss:$0 sm:$0xff] }
  0x2e   : > { %1694 = vmatprep.subr.bf16.mxu0 %v1693_v5  ;;  %s372_s18 = scalar_lea.vmem %s2303_s1, %s1465_s29  ;;  %1698 = vmatprep.subr.bf16.mxu1 %v1697_v10  ;;  %v1701_v32 = vpack.c.bf16 %v519_v31, %v518_v30  ;;  %v1705_v35 = vpack.c.bf16 %v400_v34, %v399_v33  ;;  %v401_v41 = vld [vmem:[%s2307_s5 + $0x10] sm:$0xff]  ;;  %v402_v42 = vld [vmem:[%s2307_s5 + $0x18] sm:$0xff]  ;;  %v819_v58 = vld [vmem:[%s2307_s5 + $0x40] sm:$0xff]  ;;  %s2261_s29 = scalar_lea.sflag [#allocation3], %s365_s12 }
  0x2f   : > { %v381_v12 = vstv %s379_s27  ;;  %v375_v13 = vld [vmem:[%s372_s18] sm:$0xff]  ;;  %v376_v15 = vld [vmem:[%s372_s18 + $0x8] sm:$0xff]  ;;  %v377_v16 = vld [vmem:[%s372_s18 + $0x10] sm:$0xff]  ;;  %1700 = vmatpush3.bf16.msra.mxu1 %v1697_v10  ;;  %v1709_v48 = vpack.c.bf16 %v402_v42, %v401_v41  ;;  %s1512_s27 = sshll.u32 %s2006_s17, 9  ;;  %s1927_s17 = smov [#allocation5]  }
  0x30   : > { %v386_v14 = vstv %s1466_s30  ;;  %v382_v17 = vmul.f32 %v381_v12, %v375_v13  ;;  %v383_v18 = vmul.f32 %v381_v12, %v376_v15  ;;  %v384_v19 = vmul.f32 %v381_v12, %v377_v16  ;;  %v378_v20 = vld [vmem:[%s372_s18 + $0x18] sm:$0xff]  ;;  %1702 = vmatprep.subr.bf16.mxu1 %v1701_v32  ;;  %v820_v59 = vld [vmem:[%s2307_s5 + $0x48] sm:$0xff]  ;;  %v821_v7 = vld [vmem:[%s2307_s5 + $0x50] sm:$0xff]  ;;  %s1463_s18 = sshll.u32 %s365_s12, 5  ;;  %s2259_s28 = scalar_lea.hbm %s2312_s10, %s1512_s27 }
  0x31   : > { %1696 = vmatpush3.bf16.msra.mxu0 %v1693_v5  ;;  %v385_v23 = vmul.f32 %v381_v12, %v378_v20  ;;  %v1721_v6 = vpack.c.bf16 %v820_v59, %v819_v58  ;;  %v822_v8 = vld [vmem:[%s2307_s5 + $0x58] sm:$0xff]  ;;  %s367_s25 = scalar_lea.vmem [#allocation5], %s1463_s18  ;;  %s1861_s18 = sshll.u32 %s1927_s17, 4  ;;  %s1862_s18 = int_to_ptr.vmem [resolvable:$false] %s1861_s18 }
  0x32   : > { %1714 = vmatprep.subr.bf16.mxu0 %v1713_v11  ;;  %v387_v24 = vadd.f32 %v386_v14, %v382_v17  ;;  %v388_v25 = vadd.f32 %v386_v14, %v383_v18  ;;  %v2085_v26 = vadd.f32 %v386_v14, %v384_v19  ;;  %v1725_v18 = vpack.c.bf16 %v822_v8, %v821_v7  ;;  %v1045_v42 = vld [vmem:[%s2307_s5 + $0x78] sm:$0xff]  ;;  %s1383_s21 = sshll.u32 %s367_s25, 4  ;;  %s1863_s0 = scalar_lea.vmem %s1862_s18, 1024  ;;  %s2254_s21 = int_to_ptr.vmem [resolvable:$true] %s1383_s21 }
  0x33   : > { %v390_v28 = vadd.f32 %v386_v14, %v385_v23  ;;  %1704 = vmatpush3.bf16.msra.mxu1 %v1701_v32  ;;  %s1857_s11 = scalar_lea.vmem %s2254_s21, 512  ;;  %p1864_p13 = scmp.lt.s32.totalorder %s2254_s21, %s1862_s18 }
  0x34   : > { %1585 = vmatprep.mubr.msk.f32.mxu0 %vm403_vm0, %v387_v24  ;;  %1706 = vmatprep.subr.bf16.mxu1 %v1705_v35  ;;  %v925_v45 = vmul.f32 2.0, %v388_v25  ;;  %v924_v55 = vmul.f32 2.0, %v387_v24  ;;  %v926_v10 = vmul.f32 2.0, %v2085_v26  ;;  %p1858_p10 = scmp.ne.s32.totalorder %s2254_s21, %s1857_s11  ;;  %p1865_p0 = scmp.lt.s32.totalorder %s1863_s0, %s1857_s11 }
  0x35   : > { %1586 = vmatmul.mubr.msk.f32.vlgmr.msra.gmra.mrb[0].mxu0 %vm403_vm0, %v388_v25  ;;  %v927_v62 = vmul.f32 2.0, %v390_v28 }
  0x36   : > { %1716 = vmatpush3.bf16.msra.mxu0 %v1713_v11  ;;  %1588 = vmatprep.mubr.msk.f32.mxu0 %vm403_vm0, %v2085_v26  ;;  %p1859_p11 = pnand %p1858_p10, %p2023_p5  ;;  %p1866_p1 = por %p1865_p0, %p1864_p13 }
  0x37   : > { %1718 = vmatprep.subr.bf16.mxu0 %v1717_v27 }
  0x38   : > { %p1860_p12 = pneg %p1859_p11 }
  0x39   : > { %1589 = vmatmul.mubr.msk.f32.gmra.mrb[2].mxu0 %vm403_vm0, %v390_v28 }
  0x3a   : > { %1720 = vmatpush3.bf16.msra.mxu0 %v1717_v27  ;;  %1627 = vmatprep.mubr.msk.f32.mxu0 %vm403_vm0, %v1926_v29  ;;  %p1867_p2 = pnand %p1866_p1, %p1860_p12 }
  0x3b   : > { %1730 = vmatprep.subr.bf16.mxu0 %v1713_v11 }
  0x3d   : > { %1628 = vmatmul.mubr.msk.f32.vlgmr.msra.gmra.mrb[4].mxu0 %vm403_vm0, %v1926_v29 }
  0x3e   : > { %1630 = vmatprep.mubr.msk.f32.mxu0 %vm403_vm0, %v1926_v29  ;;  %1732 = vmatpush3.bf16.msra.mxu0 %v1713_v11 }
  0x3f   : > { %1734 = vmatprep.subr.bf16.mxu0 %v1717_v27 }
  0x41   : > { %1631 = vmatmul.mubr.msk.f32.gmra.mrb[6].mxu0 %vm403_vm0, %v1926_v29 }
  0x42   : > { %1736 = vmatpush3.bf16.msra.mxu0 %v1717_v27 }
 0x108   : > { %v1587_v37 = vpop.f32.mrb[0].mxu0 }
 0x109   : > { %v509_v38 = vadd.f32 %v1587_v37, %v1471_v36  ;;  %v706_v39 = vadd.f32 %v1587_v37, %v388_v25  ;;  %v482_v40 = vpop.f32.mrb[1].mxu0  ;;  %v929_v2 = vadd.f32 %v1587_v37, %v925_v45 }
 0x10a   : > { %v508_v43 = vadd.f32 %v1471_v36, %v482_v40  ;;  %v705_v44 = vadd.f32 %v482_v40, %v387_v24  ;;  %v928_v9 = vadd.f32 %v924_v55, %v482_v40  ;;  %v1043_v40 = vld [vmem:[%s2307_s5 + $0x68] sm:$0xff] }
 0x10b   : > { %v2123_v49 = vmul.f32 2.0, %v509_v38  ;;  %v710_v50 = vmul.f32 2.0, %v706_v39  ;;  %v933_v19 = vmul.f32 2.0, %v929_v2  ;;  %v1042_v39 = vld [vmem:[%s2307_s5 + $0x60] sm:$0xff] }
 0x10c   : > { %v2121_v46 = vmul.f32 2.0, %v508_v43  ;;  %v1590_v47 = vpop.f32.mrb[2].mxu0  ;;  %v709_v54 = vmul.f32 2.0, %v705_v44  ;;  %v932_v24 = vmul.f32 2.0, %v928_v9  ;;  %v1737_v41 = vpack.c.bf16 %v1043_v40, %v1042_v39 }
 0x10d   : > { %v511_v51 = vadd.f32 %v1590_v47, %v1471_v36  ;;  %v708_v52 = vadd.f32 %v1590_v47, %v390_v28  ;;  %v492_v53 = vpop.f32.mrb[3].mxu0  ;;  %v714_v3 = vmul.f32 %v710_v50, %v2123_v49  ;;  %v931_v20 = vadd.f32 %v1590_v47, %v927_v62 }
 0x10e   : > { %v510_v56 = vadd.f32 %v1471_v36, %v492_v53  ;;  %v707_v57 = vadd.f32 %v492_v53, %v2085_v26  ;;  %1599 = vmatprep.mubr.msk.f32.mxu1 %vm403_vm0, %v2121_v46  ;;  %1655 = vmatprep.mubr.msk.f32.mxu0 %vm403_vm0, %v2121_v46  ;;  %v713_v11 = vmul.f32 %v709_v54, %v2121_v46 }
 0x10f   : > { %v2136_v60 = vmul.f32 2.0, %v511_v51  ;;  %v712_v61 = vmul.f32 2.0, %v708_v52  ;;  %1600 = vmatmul.mubr.msk.f32.vlgmr.msra.gmra.mrb[0].mxu1 %vm403_vm0, %v2123_v49  ;;  %1656 = vmatmul.mubr.msk.f32.vlgmr.msra.gmra.mrb[8].mxu0 %vm403_vm0, %v2123_v49  ;;  %v930_v25 = vadd.f32 %v926_v10, %v492_v53  ;;  %v935_v33 = vmul.f32 2.0, %v931_v20  ;;  %v1260_v20 = vld [vmem:[%s2310_s8 + $0x18] sm:$0xff] }
 0x110   : > { %v2142_v63 = vmul.f32 2.0, %v510_v56  ;;  %v711_v0 = vmul.f32 2.0, %v707_v57  ;;  %1708 = vmatpush3.bf16.msra.mxu1 %v1705_v35  ;;  %v1629_v1 = vpop.f32.mrb[4].mxu0 }
 0x111   : > { %v803_v4 = vmul.f32 2.0, %v1629_v1  ;;  %v783_v5 = vpop.f32.mrb[5].mxu0  ;;  %1710 = vmatprep.subr.bf16.mxu1 %v1709_v48  ;;  %v716_v14 = vmul.f32 %v712_v61, %v2136_v60  ;;  %v934_v35 = vmul.f32 2.0, %v930_v25 }
 0x112   : > { %v802_v12 = vmul.f32 2.0, %v783_v5  ;;  %1602 = vmatprep.mubr.msk.f32.mxu1 %vm403_vm0, %v2142_v63  ;;  %1658 = vmatprep.mubr.msk.f32.mxu0 %vm403_vm0, %v2142_v63  ;;  %v715_v17 = vmul.f32 %v711_v0, %v2142_v63 }
 0x113   : > { %v811_v13 = vsub.f32 %v714_v3, %v803_v4  ;;  %1603 = vmatmul.mubr.msk.f32.gmra.mrb[2].mxu1 %vm403_vm0, %v2136_v60  ;;  %1659 = vmatmul.mubr.msk.f32.gmra.mrb[10].mxu0 %vm403_vm0, %v2136_v60 }
 0x114   : > { %v810_v15 = vsub.f32 %v713_v11, %v802_v12  ;;  %1712 = vmatpush3.bf16.msra.mxu1 %v1709_v48  ;;  %v1632_v16 = vpop.f32.mrb[6].mxu0  ;;  %1613 = vmatprep.mubr.msk.f32.mxu1 %vm403_vm0, %v1926_v29 }
 0x115   : > { %v816_v21 = vmul.f32 0.5, %v811_v13  ;;  %v805_v22 = vmul.f32 2.0, %v1632_v16  ;;  %v793_v23 = vpop.f32.mrb[7].mxu0  ;;  %1722 = vmatprep.subr.bf16.mxu1 %v1721_v6  ;;  %v1257_v16 = vld [vmem:[%s2310_s8] sm:$0xff] }
 0x116   : > { %v815_v26 = vmul.f32 0.5, %v810_v15  ;;  %v804_v27 = vmul.f32 2.0, %v793_v23 }
 0x117   : > { %v937_v28 = vmul.f32 %v933_v19, %v816_v21  ;;  %v813_v30 = vsub.f32 %v716_v14, %v805_v22  ;;  %1614 = vmatmul.mubr.msk.f32.vlgmr.msra.gmra.mrb[0].mxu1 %vm403_vm0, %v1926_v29 }
 0x118   : > { %v936_v31 = vmul.f32 %v932_v24, %v815_v26  ;;  %v812_v32 = vsub.f32 %v715_v17, %v804_v27  ;;  %1724 = vmatpush3.bf16.msra.mxu1 %v1721_v6  ;;  %1616 = vmatprep.mubr.msk.f32.mxu1 %vm403_vm0, %v1926_v29  ;;  %v1258_v17 = vld [vmem:[%s2310_s8 + $0x8] sm:$0xff] }
 0x119   : > { %v818_v34 = vmul.f32 0.5, %v813_v30  ;;  %1726 = vmatprep.subr.bf16.mxu1 %v1725_v18  ;;  %v1745_v19 = vpack.c.bf16 %v1258_v17, %v1257_v16 }
 0x11a   : > { %v817_v36 = vmul.f32 0.5, %v812_v32 }
 0x11b   : > { %v939_v37 = vmul.f32 %v935_v33, %v818_v34  ;;  %1617 = vmatmul.mubr.msk.f32.gmra.mrb[2].mxu1 %vm403_vm0, %v1926_v29  ;;  %v1044_v29 = vld [vmem:[%s2307_s5 + $0x70] sm:$0xff]  ;;  %1746 = vmatprep.subr.bf16.mxu0 %v1745_v19 }
 0x11c   : > { %v938_v38 = vmul.f32 %v934_v35, %v817_v36  ;;  %1728 = vmatpush3.bf16.msra.mxu1 %v1725_v18  ;;  %1641 = vmatprep.mubr.msk.f32.mxu1 %vm403_vm0, %v815_v26  ;;  %v1741_v43 = vpack.c.bf16 %v1045_v42, %v1044_v29  ;;  %v1259_v18 = vld [vmem:[%s2310_s8 + $0x10] sm:$0xff] }
 0x11d   : > { %1738 = vmatprep.subr.bf16.mxu1 %v1737_v41  ;;  %1748 = vmatpush3.bf16.msra.mxu0 %v1745_v19 }
 0x11f   : > { %1642 = vmatmul.mubr.msk.f32.vlgmr.msra.gmra.mrb[0].mxu1 %vm403_vm0, %v816_v21  ;;  %v1749_v21 = vpack.c.bf16 %v1260_v20, %v1259_v18 }
 0x120   : > { %1644 = vmatprep.mubr.msk.f32.mxu1 %vm403_vm0, %v817_v36  ;;  %1740 = vmatpush3.bf16.msra.mxu1 %v1737_v41 }
 0x121   : > { %1742 = vmatprep.subr.bf16.mxu1 %v1741_v43  ;;  %1750 = vmatprep.subr.bf16.mxu0 %v1749_v21 }
 0x122   : > { %1752 = vmatpush3.bf16.msra.mxu0 %v1749_v21 }
 0x123   : > { %1645 = vmatmul.mubr.msk.f32.gmra.mrb[2].mxu1 %vm403_vm0, %v818_v34 }
 0x124   : > { %1744 = vmatpush3.bf16.msra.mxu1 %v1741_v43 }
 0x1e2   : > { %v1657_v44 = vpop.f32.mrb[8].mxu0 }
 0x1e3   : > { %v1026_v45 = vmul.f32 2.0, %v1657_v44  ;;  %v1006_v47 = vpop.f32.mrb[9].mxu0 }
 0x1e4   : > { %v1025_v48 = vmul.f32 2.0, %v1006_v47 }
 0x1e5   : > { %v1030_v50 = vadd.f32 %v1026_v45, %v2123_v49 }
 0x1e6   : > { %v1029_v51 = vadd.f32 %v1025_v48, %v2121_v46  ;;  %v1660_v52 = vpop.f32.mrb[10].mxu0 }
 0x1e7   : > { %v1034_v53 = vsub.f32 %v937_v28, %v1030_v50  ;;  %v1028_v54 = vmul.f32 2.0, %v1660_v52  ;;  %v1016_v55 = vpop.f32.mrb[11].mxu0 }
 0x1e8   : > { %v1033_v56 = vsub.f32 %v936_v31, %v1029_v51  ;;  %v1027_v57 = vmul.f32 2.0, %v1016_v55 }
 0x1e9   : > { %v1032_v58 = vadd.f32 %v1028_v54, %v2136_v60  ;;  %v1039_v62 = vmul.f32 0.33333334, %v1034_v53  ;;  %v1496_v54 = vld [vmem:[%s2308_s6] ss:$0 sm:$0xff] }
 0x1ea   : > { %v1038_v59 = vmul.f32 0.33333334, %v1033_v56  ;;  %v1031_v61 = vadd.f32 %v1027_v57, %v2142_v63  ;;  %v1497_v56 = vld [vmem:[%s2309_s7] ss:$0 sm:$0xff] }
 0x1eb   : > { %v1036_v0 = vsub.f32 %v939_v37, %v1032_v58 }
 0x1ec   : > { %v1035_v1 = vsub.f32 %v938_v38, %v1031_v61  ;;  %1669 = vmatprep.mubr.msk.f32.mxu1 %vm403_vm0, %v1038_v59 }
 0x1ed   : > { %1670 = vmatmul.mubr.msk.f32.vlgmr.msra.gmra.mrb[0].mxu1 %vm403_vm0, %v1039_v62  ;;  %v1041_v46 = vmul.f32 0.33333334, %v1036_v0 }
 0x1ee   : > { %v1040_v49 = vmul.f32 0.33333334, %v1035_v1 }
 0x1f0   : > { %1672 = vmatprep.mubr.msk.f32.mxu1 %vm403_vm0, %v1040_v49 }
 0x1f1   : > { %1673 = vmatmul.mubr.msk.f32.gmra.mrb[2].mxu1 %vm403_vm0, %v1041_v46 }
 0x2c0   : > { %v2195_v2 = vpop.f32.mrb[0].mxu1 }
 0x2c1   : > { %v2197_v3 = vpop.f32.mrb[1].mxu1  ;;  %v1150_v60 = vsel %vm403_vm0, %v2195_v2, 0.0  ;;  %v1164_v63 = vmul.f32 %v2195_v2, %v2195_v2 }
 0x2c2   : > { %1151 = vadd.xlane.f32.xlu0 %v1150_v60  ;;  %v1163_v5 = vmul.f32 %v2197_v3, %v2197_v3  ;;  %v1147_v8 = vsel %vm403_vm0, %v2197_v3, 0.0 }
 0x2c3   : > { %v1170_v4 = vsel %vm403_vm0, %v1164_v63, 0.0 }
 0x2c4   : > { %1171 = vadd.xlane.f32.xlu1 %v1170_v4  ;;  %v2206_v6 = vpop.f32.mrb[2].mxu1  ;;  %v1167_v9 = vsel %vm403_vm0, %v1163_v5, 0.0 }
 0x2c5   : > { %v2208_v7 = vpop.f32.mrb[3].mxu1  ;;  %v1156_v12 = vsel %vm403_vm0, %v2206_v6, 0.0  ;;  %v1166_v13 = vmul.f32 %v2206_v6, %v2206_v6 }
 0x2c6   : > { %1148 = vadd.xlane.f32.xlu0 %v1147_v8  ;;  %v1165_v10 = vmul.f32 %v2208_v7, %v2208_v7  ;;  %v1153_v11 = vsel %vm403_vm0, %v2208_v7, 0.0 }
 0x2c7   : > { %v1176_v15 = vsel %vm403_vm0, %v1166_v13, 0.0 }
 0x2c8   : > { %1168 = vadd.xlane.f32.xlu1 %v1167_v9  ;;  %v1173_v14 = vsel %vm403_vm0, %v1165_v10, 0.0 }
 0x2ca   : > { %1154 = vadd.xlane.f32.xlu0 %v1153_v11 }
 0x2cc   : > { %1157 = vadd.xlane.f32.xlu1 %v1156_v12 }
 0x2ce   : > { %1174 = vadd.xlane.f32.xlu0 %v1173_v14 }
 0x2d0   : > { %1177 = vadd.xlane.f32.xlu1 %v1176_v15 }
 0x34f   : > { %v1152_v22 = vpop.xlane.xlu0 %1151 }
 0x350   : > { %v1160_v23 = vmul.f32 0.03125, %v1152_v22 }
 0x351   : > { %v1172_v24 = vpop.xlane.xlu1 %1171 }
 0x352   : > { %v1184_v25 = vmul.f32 %v1160_v23, %v1160_v23  ;;  %v1180_v26 = vmul.f32 0.03125, %v1172_v24  ;;  %v1192_v51 = vsub.f32 %v2195_v2, %v1160_v23 }
 0x353   : > { %v1149_v27 = vpop.xlane.xlu0 %1148 }
 0x354   : > { %v1188_v28 = vsub.f32 %v1180_v26, %v1184_v25  ;;  %v1159_v30 = vmul.f32 0.03125, %v1149_v27 }
 0x355   : > { %v1169_v31 = vpop.xlane.xlu1 %1168 }
 0x356   : > { %v1196_v32 = vadd.f32 1e-05, %v1188_v28  ;;  %v1183_v33 = vmul.f32 %v1159_v30, %v1159_v30  ;;  %v1179_v34 = vmul.f32 0.03125, %v1169_v31  ;;  %v1191_v57 = vsub.f32 %v2197_v3, %v1159_v30  ;;  %v1502_v28 = vld [vmem:[%s2311_s9] ss:$0 sm:$0xff] }
 0x357   : > { %v1155_v35 = vpop.xlane.xlu0 %1154 }
 0x358   : > { %1818 = vrsqrt.f32 %v1196_v32  ;;  %v1187_v36 = vsub.f32 %v1179_v34, %v1183_v33  ;;  %v1161_v37 = vmul.f32 0.03125, %v1155_v35 }
 0x359   : > { %v1158_v38 = vpop.xlane.xlu1 %1157 }
 0x35a   : > { %v1195_v39 = vadd.f32 1e-05, %v1187_v36  ;;  %v1162_v40 = vmul.f32 0.03125, %v1158_v38  ;;  %v1185_v29 = vmul.f32 %v1161_v37, %v1161_v37  ;;  %v1193_v49 = vsub.f32 %v2208_v7, %v1161_v37 }
 0x35b   : > { %v1175_v41 = vpop.xlane.xlu0 %1174 }
 0x35c   : > { %1820 = vrsqrt.f32 %v1195_v39  ;;  %v1181_v42 = vmul.f32 0.03125, %v1175_v41  ;;  %v1186_v44 = vmul.f32 %v1162_v40, %v1162_v40  ;;  %v1194_v60 = vsub.f32 %v2206_v6, %v1162_v40 }
 0x35d   : > { %v1178_v43 = vpop.xlane.xlu1 %1177 }
 0x35e   : > { %v1189_v45 = vsub.f32 %v1181_v42, %v1185_v29  ;;  %v1182_v47 = vmul.f32 0.03125, %v1178_v43 }
 0x360   : > { %v1197_v48 = vadd.f32 1e-05, %v1189_v45  ;;  %v1190_v50 = vsub.f32 %v1182_v47, %v1186_v44 }
 0x362   : > { %v1819_v52 = vpop.eup %1818  ;;  %1822 = vrsqrt.f32 %v1197_v48  ;;  %v1198_v53 = vadd.f32 1e-05, %v1190_v50 }
 0x363   : > { %v1204_v55 = vmul.f32 %v1819_v52, %v1192_v51 }
 0x364   : > { %1824 = vrsqrt.f32 %v1198_v53 }
 0x365   : > { %v1215_v58 = vmul.f32 %v1496_v54, %v1204_v55 }
 0x366   : > { %v1821_v59 = vpop.eup %1820 }
 0x367   : > { %v1203_v61 = vmul.f32 %v1821_v59, %v1191_v57  ;;  %v1226_v62 = vadd.f32 %v1497_v56, %v1215_v58 }
 0x369   : > { %v1214_v0 = vmul.f32 %v1496_v54, %v1203_v61  ;;  %v1499_v1 = vmul.f32 -1.442695, %v1226_v62 }
 0x36b   : > { %v1225_v46 = vadd.f32 %v1497_v56, %v1214_v0  ;;  %1826 = vpow2.f32 %v1499_v1 }
 0x36c   : > { %v1823_v2 = vpop.eup %1822 }
 0x36d   : > { %v1498_v63 = vmul.f32 -1.442695, %v1225_v46  ;;  %v1205_v4 = vmul.f32 %v1823_v2, %v1193_v49 }
 0x36e   : > { %v1825_v5 = vpop.eup %1824 }
 0x36f   : > { %1828 = vpow2.f32 %v1498_v63  ;;  %v1216_v8 = vmul.f32 %v1496_v54, %v1205_v4  ;;  %v1206_v9 = vmul.f32 %v1825_v5, %v1194_v60 }
 0x371   : > { %v1227_v3 = vadd.f32 %v1497_v56, %v1216_v8  ;;  %v1217_v10 = vmul.f32 %v1496_v54, %v1206_v9 }
 0x373   : > { %v1500_v11 = vmul.f32 -1.442695, %v1227_v3  ;;  %v1228_v12 = vadd.f32 %v1497_v56, %v1217_v10 }
 0x375   : > { %v1827_v13 = vpop.eup %1826  ;;  %1830 = vpow2.f32 %v1500_v11  ;;  %v1501_v14 = vmul.f32 -1.442695, %v1228_v12 }
 0x376   : > { %v1242_v15 = vadd.f32 1.0, %v1827_v13 }
 0x377   : > { %1832 = vpow2.f32 %v1501_v14 }
 0x378   : > { %1834 = vrcp.f32 %v1242_v15 }
 0x379   : > { %v1829_v7 = vpop.eup %1828 }
 0x37a   : > { %v1241_v16 = vadd.f32 1.0, %v1829_v7 }
 0x37c   : > { %1836 = vrcp.f32 %v1241_v16 }
 0x37f   : > { %v1831_v6 = vpop.eup %1830 }
 0x380   : > { %v1243_v17 = vadd.f32 1.0, %v1831_v6 }
 0x381   : > { %v1833_v18 = vpop.eup %1832 }
 0x382   : > { %1838 = vrcp.f32 %v1243_v17  ;;  %v1244_v19 = vadd.f32 1.0, %v1833_v18  ;;  %v1835_v20 = vpop.eup %1834 }
 0x383   : > { %v1254_v23 = vmul.f32 %v1835_v20, %v1226_v62 }
 0x384   : > { %1840 = vrcp.f32 %v1244_v19 }
 0x386   : > { %v1837_v21 = vpop.eup %1836 }
 0x387   : > { %v1253_v22 = vmul.f32 %v1837_v21, %v1225_v46 }
 0x389   : > { %1683 = vmatprep.mubr.msk.f32.mxu0 %vm403_vm0, %v1253_v22 }
 0x38a   : > { %1684 = vmatmul.mubr.msk.f32.vlgmr.msra.gmra.mrb[12].mxu0 %vm403_vm0, %v1254_v23 }
 0x38c   : > { %v1839_v24 = vpop.eup %1838 }
 0x38d   : > { %v1255_v25 = vmul.f32 %v1839_v24, %v1227_v3 }
 0x38e   : > { %v1841_v26 = vpop.eup %1840 }
 0x38f   : > { %1686 = vmatprep.mubr.msk.f32.mxu0 %vm403_vm0, %v1255_v25  ;;  %v1256_v27 = vmul.f32 %v1841_v26, %v1228_v12 }
 0x391   : > { %1687 = vmatmul.mubr.msk.f32.gmra.mrb[14].mxu0 %vm403_vm0, %v1256_v27 }
 0x45d   : > { %v1685_v30 = vpop.f32.mrb[12].mxu0 }
 0x45e   : > { %v1352_v31 = vadd.f32 %v1685_v30, %v1502_v28  ;;  %v1346_v32 = vpop.f32.mrb[13].mxu0 }
 0x45f   : > { %v1347_v33 = vadd.f32 %v1502_v28, %v1346_v32 }
 0x460   : > { %1366 = vst [vmem:[%s367_s25 + $0x8] sm:$0xff] %v1352_v31 }
 0x461   : > { %1365 = vst [vmem:[%s367_s25] sm:$0xff] %v1347_v33 }
 0x464   : > { %v1688_v34 = vpop.f32.mrb[14].mxu0 }
 0x465   : > { %v1362_v35 = vadd.f32 %v1688_v34, %v1502_v28  ;;  %v1356_v36 = vpop.f32.mrb[15].mxu0 }
 0x466   : > { %v1357_v37 = vadd.f32 %v1502_v28, %v1356_v36 }
 0x467   : > { %1368 = vst [vmem:[%s367_s25 + $0x18] sm:$0xff] %v1362_v35 }
 0x468   : > { %1367 = vst [vmem:[%s367_s25 + $0x10] sm:$0xff] %v1357_v37 }
 0x469   : > { %1870 = shalt.err (!%p1867_p2)
}
 0x46a   : > { %s1871_s12 = scalar_lea.hbm %s2259_s28, 512  ;;  %s1875_s27 = scalar_lea.hbm %s2312_s10, 1024 }
 0x46b   : > { %p1872_p3 = scmp.ne.s32.totalorder %s2259_s28, %s1871_s12  ;;  %p1876_p8 = scmp.lt.u32.totalorder %s2259_s28, %s2312_s10 }
 0x46c   : > { %p1877_p9 = scmp.lt.u32.totalorder %s1875_s27, %s1871_s12  ;;  %p1879_p11 = scmp.lt.u32.totalorder %s1871_s12, %s2259_s28 }
 0x46d   : > { %p1873_p4 = pnand %p1872_p3, %p2023_p5 }
 0x46e   : > { %p1878_p10 = por %p1877_p9, %p1876_p8 }
 0x46f   : > { %p1874_p7 = pneg %p1873_p4 }
 0x470   : > { %p1880_p12 = por %p1879_p11, %p1878_p10 }
 0x472   : > { %p1881_p13 = pnand %p1880_p12, %p1874_p7 }
 0x474   : > { %1884 = shalt.err (!%p1881_p13)
}
 0x475   : > { %s1928_s11 = smov 128   ;;  %s1929_s17 = smov 8  }
 0x476   : > { %1769 = dma.vmem_to_hbm [thread:$0]  (%p2023_p5), %s2254_s21, 512, %s2259_s28, %s2261_s29, %s1928_s11, %s1928_s11, %s1929_s17  }
 0x477 PF: > { %p1781_p0 = scmp.ge.s32.totalorder %s1923_s16, 2  ;;  %s1398_s18 = sand.u32 1, %s1911_s13  }
 0x478   : > { %s1399_s0 = scalar_lea.sflag [#allocation3], %s1398_s18 }
 0x479   : > { %p1776_p1 = pnand %p1781_p0, %p2027_p6 }
 0x47b   : > { %1906 = dma.done.wait (!%p1776_p1), %s1399_s0, 512  }
 0x47c   : > { %1908 = vsyncadd (!%p1776_p1), %s1399_s0, 4294966784  ;;  %p21_p2 = scmp.ge.s32.totalorder %s2010_s19, 4   ;;  %s2318_s13 = smov %s1915_s14 }
 0x47d   : > { %s2319_s14 = smov %s1919_s15  ;;  %s2320_s15 = smov %s2021_s22 }
 0x47e   : > { %s2321_s16 = smov %s2010_s19  ;;  %23 = sbr.rel (!%p21_p2) target bundleno = 6 (0x6), region = 100 }
 0x485   :  { %1404 = vsyncpa [#allocation3], 1 }
 0x486   :  { %1406 = vsyncpa [#allocation3 + $0x1], 1 }
 0x487   :  { %1407 = vsyncpa [#allocation4], 1 }
 0x488   :  { %1409 = vsyncpa [#allocation4 + $0x1], 1 }

// kernel: tpu_custom_call.1
= control target key start
LH: loop header
LB: loop body
LE: loop exit
PB: predicated region body
PF: predicated region fallthrough
CT: control target
= control target key end

     0   :  { %s2302_s0 = inlined_call_operand.vmem [shape: f32[1,2], index: 0, kind: input, shape index: {}]   ;;  %s2303_s1 = inlined_call_operand.vmem [shape: f32[64,32], index: 1, kind: input, shape index: {}]   ;;  %s2304_s2 = inlined_call_operand.vmem [shape: f32[32,32], index: 2, kind: input, shape index: {}]   ;;  %s2305_s3 = inlined_call_operand.vmem [shape: f32[32,32], index: 3, kind: input, shape index: {}]   ;;  %s2306_s4 = inlined_call_operand.vmem [shape: f32[1,32], index: 4, kind: input, shape index: {}]   ;;  %s2307_s5 = inlined_call_operand.vmem [shape: f32[128,32], index: 5, kind: input, shape index: {}]   ;;  %s2308_s6 = inlined_call_operand.vmem [shape: f32[1,32], index: 6, kind: input, shape index: {}]   ;;  %s2309_s7 = inlined_call_operand.vmem [shape: f32[1,32], index: 7, kind: input, shape index: {}]   ;;  %s2310_s8 = inlined_call_operand.vmem [shape: f32[32,128], index: 8, kind: input, shape index: {}]   ;;  %s2311_s9 = inlined_call_operand.vmem [shape: f32[1,128], index: 9, kind: input, shape index: {}]   ;;  %s2312_s10 = inlined_call_operand.hbm [shape: f32[64,128], index: 10, kind: output, shape index: {}]  }
   0x1   :  { %2313 = sst [smem:[#allocation8_spill]] %s2302_s0 }
   0x2   :  { %15 = vsyncpa [#allocation4], 0 }
   0x3   :  { %16 = vsyncpa [#allocation3], 0 }
   0x4   :  { %18 = vsyncpa [#allocation3 + $0x1], 0  ;;  %s1985_s13 = smov 0   ;;  %s1987_s14 = smov 0  }
   0x5   :  { %s1989_s15 = smov 0   ;;  %s1991_s16 = smov 0  }
   0x6 LB: > { %s2006_s17 = sadd.s32 4294967295, %s1923_s16   ;;  %s1457_s18 = sadd.s32 4294967294, %s1923_s16   ;;  %s1923_s16 = sphi %s1991_s16, %s2321_s16   ;;  %s1919_s15 = sphi %s1989_s15, %s2320_s15   ;;  %s1915_s14 = sphi %s1987_s14, %s2319_s14   ;;  %s1911_s13 = sphi %s1985_s13, %s2318_s13  }
   0x7   : > { %s2010_s19 = sadd.s32 1, %s1923_s16   ;;  %s246_s20 = sadd.s32 1, %s1919_s15 }
   0x8   : > { %s243_s21 = ssub.s32 %s1923_s16, %s2010_s19  ;;  %p256_p0 = scmp.ne.s32.totalorder %s1919_s15, %s1915_s14 }
   0x9   : > { %p244_p1 = scmp.eq.s32.totalorder %s243_s21, 0  ;;  %p257_p2 = scmp.eq.s32.totalorder %s2006_s17, 1 }
   0xa   : > { %p262_p3 = scmp.ne.s32.totalorder %s1915_s14, %s1911_s13  ;;  %p263_p4 = scmp.eq.s32.totalorder %s1457_s18, 1 }
   0xb   : > { %s2021_s22 = scalar_select %p244_p1, %s1919_s15, %s246_s20  }
   0xc   : > { %p2023_p5 = por %p257_p2, %p256_p0  ;;  %p2027_p6 = por %p263_p4, %p262_p3 }
   0xd   : > { %p1458_p7 = scmp.ge.s32.totalorder %s1923_s16, 1  ;;  %p270_p8 = scmp.lt.s32.totalorder %s1923_s16, 3 }
   0xe   : > { %p1779_p9 = scmp.eq.s32.totalorder %s2006_s17, 0  ;;  %s2317_s0 = sld [smem:[#allocation8_spill]] }
   0xf   : > { %p2034_p10 = pnand %p1458_p7, %p270_p8 }
  0x11   : > { %p1771_p11 = pneg %p2034_p10 }
  0x13   : > { %p1772_p12 = pnand %p1779_p9, %p1771_p11 }
  0x14   : > { %s283_s28 = sshll.u32 %s2317_s0, 4  ;;  %s284_s28 = int_to_ptr.vmem [resolvable:$true] %s283_s28 }
  0x15   : > { %s1842_s29 = scalar_lea.vmem %s284_s28, 16  ;;  %p1844_p0 = pneg %p1772_p12 }
  0x16   : > { %p1843_p13 = scmp.ne.s32.totalorder %s284_s28, %s1842_s29  ;;  %p1850_p3 = scmp.lt.s32.totalorder %s284_s28, %s284_s28 }
  0x17   : > { %p1851_p4 = scmp.lt.s32.totalorder %s1842_s29, %s1842_s29 }
  0x18   : > { %p1845_p1 = pnand %p1844_p0, %p1843_p13 }
  0x19   : > { %p1852_p7 = por %p1851_p4, %p1850_p3 }
  0x1a   : > { %p1846_p2 = pneg %p1845_p1 }
  0x1c   : > { %p1853_p8 = pnand %p1852_p7, %p1846_p2 }
  0x1e   : > { %1856 = shalt.err (!%p1853_p8)
}
  0x1f   : > { %s1925_s30 = smov [#allocation2]   ;;  %329 = sbr.rel (%p2034_p10) target bundleno = 1143 (0x477), region = 60 }
  0x20   : > { %1774 = dma.vmem_to_smem (!%p1772_p12), %s284_s28, 16, %s1925_s30, [#allocation4]  }
  0x26   : > { %1902 = dma.done.wait (%p1779_p9), [#allocation4], 16  }
  0x27   : > { %1904 = vsyncadd (%p1779_p9), [#allocation4], 4294967280 }
  0x28   : > { %335 = sfence }
  0x29   : > { %v395_v0 = vld [vmem:[%s2305_s3] sm:$0xff]  ;;  %v396_v1 = vld [vmem:[%s2305_s3 + $0x8] sm:$0xff]  ;;  %v397_v2 = vld [vmem:[%s2305_s3 + $0x10] sm:$0xff]  ;;  %s1464_s25 = sshll.u32 %s2006_s17, 2  ;;  %s379_s27 = sld [smem:[#allocation2]]  ;;  %vm403_vm0 = vcmask 261120  }
  0x2a   : > { %v1689_v3 = vpack.c.bf16 %v396_v1, %v395_v0  ;;  %v398_v4 = vld [vmem:[%s2305_s3 + $0x18] sm:$0xff]  ;;  %p369_p9 = scmp.lt.s32.totalorder %s1464_s25, 7  ;;  %s1466_s30 = sld [smem:[#allocation2 + $0x1]]  ;;  %v391_v6 = vld [vmem:[%s2304_s2] sm:$0xff]  ;;  %v392_v7 = vld [vmem:[%s2304_s2 + $0x8] sm:$0xff]  ;;  %v1926_v29 = vmov 1.0  }
  0x2b   : > { %v1693_v5 = vpack.c.bf16 %v398_v4, %v397_v2  ;;  %v516_v8 = vld [vmem:[%s2307_s5 + $0x20] sm:$0xff]  ;;  %v517_v9 = vld [vmem:[%s2307_s5 + $0x28] sm:$0xff]  ;;  %v1713_v11 = vpack.c.bf16 %v392_v7, %v391_v6  ;;  %v393_v21 = vld [vmem:[%s2304_s2 + $0x10] sm:$0xff]  ;;  %s365_s12 = sand.u32 1, %s1915_s14  }
  0x2c   : > { %1690 = vmatprep.subr.bf16.mxu0 %v1689_v3  ;;  %s2323_s25 = smov (!%p369_p9, %s1464_s25), 7  ;;  %v1697_v10 = vpack.c.bf16 %v517_v9, %v516_v8  ;;  %v394_v22 = vld [vmem:[%s2304_s2 + $0x18] sm:$0xff]  ;;  %v518_v30 = vld [vmem:[%s2307_s5 + $0x30] sm:$0xff]  ;;  %v399_v33 = vld [vmem:[%s2307_s5] sm:$0xff] }
  0x2d   : > { %1692 = vmatpush3.bf16.msra.mxu0 %v1689_v3  ;;  %s1465_s29 = sshll.u32 %s2323_s25, 3  ;;  %v1717_v27 = vpack.c.bf16 %v394_v22, %v393_v21  ;;  %v519_v31 = vld [vmem:[%s2307_s5 + $0x38] sm:$0xff]  ;;  %v400_v34 = vld [vmem:[%s2307_s5 + $0x8] sm:$0xff]  ;;  %v1471_v36 = vld [vmem:[%s2306_s4] ss:$0 sm:$0xff] }
  0x2e   : > { %1694 = vmatprep.subr.bf16.mxu0 %v1693_v5  ;;  %s372_s18 = scalar_lea.vmem %s2303_s1, %s1465_s29  ;;  %1698 = vmatprep.subr.bf16.mxu1 %v1697_v10  ;;  %v1701_v32 = vpack.c.bf16 %v519_v31, %v518_v30  ;;  %v1705_v35 = vpack.c.bf16 %v400_v34, %v399_v33  ;;  %v401_v41 = vld [vmem:[%s2307_s5 + $0x10] sm:$0xff]  ;;  %v402_v42 = vld [vmem:[%s2307_s5 + $0x18] sm:$0xff]  ;;  %v819_v58 = vld [vmem:[%s2307_s5 + $0x40] sm:$0xff]  ;;  %s2261_s29 = scalar_lea.sflag [#allocation3], %s365_s12 }
  0x2f   : > { %v381_v12 = vstv %s379_s27  ;;  %v375_v13 = vld [vmem:[%s372_s18] sm:$0xff]  ;;  %v376_v15 = vld [vmem:[%s372_s18 + $0x8] sm:$0xff]  ;;  %v377_v16 = vld [vmem:[%s372_s18 + $0x10] sm:$0xff]  ;;  %1700 = vmatpush3.bf16.msra.mxu1 %v1697_v10  ;;  %v1709_v48 = vpack.c.bf16 %v402_v42, %v401_v41  ;;  %s1512_s27 = sshll.u32 %s2006_s17, 9  ;;  %s1927_s17 = smov [#allocation5]  }
  0x30   : > { %v386_v14 = vstv %s1466_s30  ;;  %v382_v17 = vmul.f32 %v381_v12, %v375_v13  ;;  %v383_v18 = vmul.f32 %v381_v12, %v376_v15  ;;  %v384_v19 = vmul.f32 %v381_v12, %v377_v16  ;;  %v378_v20 = vld [vmem:[%s372_s18 + $0x18] sm:$0xff]  ;;  %1702 = vmatprep.subr.bf16.mxu1 %v1701_v32  ;;  %v820_v59 = vld [vmem:[%s2307_s5 + $0x48] sm:$0xff]  ;;  %v821_v7 = vld [vmem:[%s2307_s5 + $0x50] sm:$0xff]  ;;  %s1463_s18 = sshll.u32 %s365_s12, 5  ;;  %s2259_s28 = scalar_lea.hbm %s2312_s10, %s1512_s27 }
  0x31   : > { %1696 = vmatpush3.bf16.msra.mxu0 %v1693_v5  ;;  %v385_v23 = vmul.f32 %v381_v12, %v378_v20  ;;  %v1721_v6 = vpack.c.bf16 %v820_v59, %v819_v58  ;;  %v822_v8 = vld [vmem:[%s2307_s5 + $0x58] sm:$0xff]  ;;  %s367_s25 = scalar_lea.vmem [#allocation5], %s1463_s18  ;;  %s1861_s18 = sshll.u32 %s1927_s17, 4  ;;  %s1862_s18 = int_to_ptr.vmem [resolvable:$false] %s1861_s18 }
  0x32   : > { %1714 = vmatprep.subr.bf16.mxu0 %v1713_v11  ;;  %v387_v24 = vadd.f32 %v386_v14, %v382_v17  ;;  %v388_v25 = vadd.f32 %v386_v14, %v383_v18  ;;  %v2085_v26 = vadd.f32 %v386_v14, %v384_v19  ;;  %v1725_v18 = vpack.c.bf16 %v822_v8, %v821_v7  ;;  %v1045_v42 = vld [vmem:[%s2307_s5 + $0x78] sm:$0xff]  ;;  %s1383_s21 = sshll.u32 %s367_s25, 4  ;;  %s1863_s0 = scalar_lea.vmem %s1862_s18, 1024  ;;  %s2254_s21 = int_to_ptr.vmem [resolvable:$true] %s1383_s21 }
  0x33   : > { %v390_v28 = vadd.f32 %v386_v14, %v385_v23  ;;  %1704 = vmatpush3.bf16.msra.mxu1 %v1701_v32  ;;  %s1857_s11 = scalar_lea.vmem %s2254_s21, 512  ;;  %p1864_p13 = scmp.lt.s32.totalorder %s2254_s21, %s1862_s18 }
  0x34   : > { %1585 = vmatprep.mubr.msk.f32.mxu0 %vm403_vm0, %v387_v24  ;;  %1706 = vmatprep.subr.bf16.mxu1 %v1705_v35  ;;  %v925_v45 = vmul.f32 2.0, %v388_v25  ;;  %v924_v55 = vmul.f32 2.0, %v387_v24  ;;  %v926_v10 = vmul.f32 2.0, %v2085_v26  ;;  %p1858_p10 = scmp.ne.s32.totalorder %s2254_s21, %s1857_s11  ;;  %p1865_p0 = scmp.lt.s32.totalorder %s1863_s0, %s1857_s11 }
  0x35   : > { %1586 = vmatmul.mubr.msk.f32.vlgmr.msra.gmra.mrb[0].mxu0 %vm403_vm0, %v388_v25  ;;  %v927_v62 = vmul.f32 2.0, %v390_v28 }
  0x36   : > { %1716 = vmatpush3.bf16.msra.mxu0 %v1713_v11  ;;  %1588 = vmatprep.mubr.msk.f32.mxu0 %vm403_vm0, %v2085_v26  ;;  %p1859_p11 = pnand %p1858_p10, %p2023_p5  ;;  %p1866_p1 = por %p1865_p0, %p1864_p13 }
  0x37   : > { %1718 = vmatprep.subr.bf16.mxu0 %v1717_v27 }
  0x38   : > { %p1860_p12 = pneg %p1859_p11 }
  0x39   : > { %1589 = vmatmul.mubr.msk.f32.gmra.mrb[2].mxu0 %vm403_vm0, %v390_v28 }
  0x3a   : > { %1720 = vmatpush3.bf16.msra.mxu0 %v1717_v27  ;;  %1627 = vmatprep.mubr.msk.f32.mxu0 %vm403_vm0, %v1926_v29  ;;  %p1867_p2 = pnand %p1866_p1, %p1860_p12 }
  0x3b   : > { %1730 = vmatprep.subr.bf16.mxu0 %v1713_v11 }
  0x3d   : > { %1628 = vmatmul.mubr.msk.f32.vlgmr.msra.gmra.mrb[4].mxu0 %vm403_vm0, %v1926_v29 }
  0x3e   : > { %1630 = vmatprep.mubr.msk.f32.mxu0 %vm403_vm0, %v1926_v29  ;;  %1732 = vmatpush3.bf16.msra.mxu0 %v1713_v11 }
  0x3f   : > { %1734 = vmatprep.subr.bf16.mxu0 %v1717_v27 }
  0x41   : > { %1631 = vmatmul.mubr.msk.f32.gmra.mrb[6].mxu0 %vm403_vm0, %v1926_v29 }
  0x42   : > { %1736 = vmatpush3.bf16.msra.mxu0 %v1717_v27 }
 0x108   : > { %v1587_v37 = vpop.f32.mrb[0].mxu0 }
 0x109   : > { %v509_v38 = vadd.f32 %v1587_v37, %v1471_v36  ;;  %v706_v39 = vadd.f32 %v1587_v37, %v388_v25  ;;  %v482_v40 = vpop.f32.mrb[1].mxu0  ;;  %v929_v2 = vadd.f32 %v1587_v37, %v925_v45 }
 0x10a   : > { %v508_v43 = vadd.f32 %v1471_v36, %v482_v40  ;;  %v705_v44 = vadd.f32 %v482_v40, %v387_v24  ;;  %v928_v9 = vadd.f32 %v924_v55, %v482_v40  ;;  %v1043_v40 = vld [vmem:[%s2307_s5 + $0x68] sm:$0xff] }
 0x10b   : > { %v2123_v49 = vmul.f32 2.0, %v509_v38  ;;  %v710_v50 = vmul.f32 2.0, %v706_v39  ;;  %v933_v19 = vmul.f32 2.0, %v929_v2  ;;  %v1042_v39 = vld [vmem:[%s2307_s5 + $0x60] sm:$0xff] }
 0x10c   : > { %v2121_v46 = vmul.f32 2.0, %v508_v43  ;;  %v1590_v47 = vpop.f32.mrb[2].mxu0  ;;  %v709_v54 = vmul.f32 2.0, %v705_v44  ;;  %v932_v24 = vmul.f32 2.0, %v928_v9  ;;  %v1737_v41 = vpack.c.bf16 %v1043_v40, %v1042_v39 }
 0x10d   : > { %v511_v51 = vadd.f32 %v1590_v47, %v1471_v36  ;;  %v708_v52 = vadd.f32 %v1590_v47, %v390_v28  ;;  %v492_v53 = vpop.f32.mrb[3].mxu0  ;;  %v714_v3 = vmul.f32 %v710_v50, %v2123_v49  ;;  %v931_v20 = vadd.f32 %v1590_v47, %v927_v62 }
 0x10e   : > { %v510_v56 = vadd.f32 %v1471_v36, %v492_v53  ;;  %v707_v57 = vadd.f32 %v492_v53, %v2085_v26  ;;  %1599 = vmatprep.mubr.msk.f32.mxu1 %vm403_vm0, %v2121_v46  ;;  %1655 = vmatprep.mubr.msk.f32.mxu0 %vm403_vm0, %v2121_v46  ;;  %v713_v11 = vmul.f32 %v709_v54, %v2121_v46 }
 0x10f   : > { %v2136_v60 = vmul.f32 2.0, %v511_v51  ;;  %v712_v61 = vmul.f32 2.0, %v708_v52  ;;  %1600 = vmatmul.mubr.msk.f32.vlgmr.msra.gmra.mrb[0].mxu1 %vm403_vm0, %v2123_v49  ;;  %1656 = vmatmul.mubr.msk.f32.vlgmr.msra.gmra.mrb[8].mxu0 %vm403_vm0, %v2123_v49  ;;  %v930_v25 = vadd.f32 %v926_v10, %v492_v53  ;;  %v935_v33 = vmul.f32 2.0, %v931_v20  ;;  %v1260_v20 = vld [vmem:[%s2310_s8 + $0x18] sm:$0xff] }
 0x110   : > { %v2142_v63 = vmul.f32 2.0, %v510_v56  ;;  %v711_v0 = vmul.f32 2.0, %v707_v57  ;;  %1708 = vmatpush3.bf16.msra.mxu1 %v1705_v35  ;;  %v1629_v1 = vpop.f32.mrb[4].mxu0 }
 0x111   : > { %v803_v4 = vmul.f32 2.0, %v1629_v1  ;;  %v783_v5 = vpop.f32.mrb[5].mxu0  ;;  %1710 = vmatprep.subr.bf16.mxu1 %v1709_v48  ;;  %v716_v14 = vmul.f32 %v712_v61, %v2136_v60  ;;  %v934_v35 = vmul.f32 2.0, %v930_v25 }
 0x112   : > { %v802_v12 = vmul.f32 2.0, %v783_v5  ;;  %1602 = vmatprep.mubr.msk.f32.mxu1 %vm403_vm0, %v2142_v63  ;;  %1658 = vmatprep.mubr.msk.f32.mxu0 %vm403_vm0, %v2142_v63  ;;  %v715_v17 = vmul.f32 %v711_v0, %v2142_v63 }
 0x113   : > { %v811_v13 = vsub.f32 %v714_v3, %v803_v4  ;;  %1603 = vmatmul.mubr.msk.f32.gmra.mrb[2].mxu1 %vm403_vm0, %v2136_v60  ;;  %1659 = vmatmul.mubr.msk.f32.gmra.mrb[10].mxu0 %vm403_vm0, %v2136_v60 }
 0x114   : > { %v810_v15 = vsub.f32 %v713_v11, %v802_v12  ;;  %1712 = vmatpush3.bf16.msra.mxu1 %v1709_v48  ;;  %v1632_v16 = vpop.f32.mrb[6].mxu0  ;;  %1613 = vmatprep.mubr.msk.f32.mxu1 %vm403_vm0, %v1926_v29 }
 0x115   : > { %v816_v21 = vmul.f32 0.5, %v811_v13  ;;  %v805_v22 = vmul.f32 2.0, %v1632_v16  ;;  %v793_v23 = vpop.f32.mrb[7].mxu0  ;;  %1722 = vmatprep.subr.bf16.mxu1 %v1721_v6  ;;  %v1257_v16 = vld [vmem:[%s2310_s8] sm:$0xff] }
 0x116   : > { %v815_v26 = vmul.f32 0.5, %v810_v15  ;;  %v804_v27 = vmul.f32 2.0, %v793_v23 }
 0x117   : > { %v937_v28 = vmul.f32 %v933_v19, %v816_v21  ;;  %v813_v30 = vsub.f32 %v716_v14, %v805_v22  ;;  %1614 = vmatmul.mubr.msk.f32.vlgmr.msra.gmra.mrb[0].mxu1 %vm403_vm0, %v1926_v29 }
 0x118   : > { %v936_v31 = vmul.f32 %v932_v24, %v815_v26  ;;  %v812_v32 = vsub.f32 %v715_v17, %v804_v27  ;;  %1724 = vmatpush3.bf16.msra.mxu1 %v1721_v6  ;;  %1616 = vmatprep.mubr.msk.f32.mxu1 %vm403_vm0, %v1926_v29  ;;  %v1258_v17 = vld [vmem:[%s2310_s8 + $0x8] sm:$0xff] }
 0x119   : > { %v818_v34 = vmul.f32 0.5, %v813_v30  ;;  %1726 = vmatprep.subr.bf16.mxu1 %v1725_v18  ;;  %v1745_v19 = vpack.c.bf16 %v1258_v17, %v1257_v16 }
 0x11a   : > { %v817_v36 = vmul.f32 0.5, %v812_v32 }
 0x11b   : > { %v939_v37 = vmul.f32 %v935_v33, %v818_v34  ;;  %1617 = vmatmul.mubr.msk.f32.gmra.mrb[2].mxu1 %vm403_vm0, %v1926_v29  ;;  %v1044_v29 = vld [vmem:[%s2307_s5 + $0x70] sm:$0xff]  ;;  %1746 = vmatprep.subr.bf16.mxu0 %v1745_v19 }
 0x11c   : > { %v938_v38 = vmul.f32 %v934_v35, %v817_v36  ;;  %1728 = vmatpush3.bf16.msra.mxu1 %v1725_v18  ;;  %1641 = vmatprep.mubr.msk.f32.mxu1 %vm403_vm0, %v815_v26  ;;  %v1741_v43 = vpack.c.bf16 %v1045_v42, %v1044_v29  ;;  %v1259_v18 = vld [vmem:[%s2310_s8 + $0x10] sm:$0xff] }
 0x11d   : > { %1738 = vmatprep.subr.bf16.mxu1 %v1737_v41  ;;  %1748 = vmatpush3.bf16.msra.mxu0 %v1745_v19 }
 0x11f   : > { %1642 = vmatmul.mubr.msk.f32.vlgmr.msra.gmra.mrb[0].mxu1 %vm403_vm0, %v816_v21  ;;  %v1749_v21 = vpack.c.bf16 %v1260_v20, %v1259_v18 }
 0x120   : > { %1644 = vmatprep.mubr.msk.f32.mxu1 %vm403_vm0, %v817_v36  ;;  %1740 = vmatpush3.bf16.msra.mxu1 %v1737_v41 }
 0x121   : > { %1742 = vmatprep.subr.bf16.mxu1 %v1741_v43  ;;  %1750 = vmatprep.subr.bf16.mxu0 %v1749_v21 }
 0x122   : > { %1752 = vmatpush3.bf16.msra.mxu0 %v1749_v21 }
 0x123   : > { %1645 = vmatmul.mubr.msk.f32.gmra.mrb[2].mxu1 %vm403_vm0, %v818_v34 }
 0x124   : > { %1744 = vmatpush3.bf16.msra.mxu1 %v1741_v43 }
 0x1e2   : > { %v1657_v44 = vpop.f32.mrb[8].mxu0 }
 0x1e3   : > { %v1026_v45 = vmul.f32 2.0, %v1657_v44  ;;  %v1006_v47 = vpop.f32.mrb[9].mxu0 }
 0x1e4   : > { %v1025_v48 = vmul.f32 2.0, %v1006_v47 }
 0x1e5   : > { %v1030_v50 = vadd.f32 %v1026_v45, %v2123_v49 }
 0x1e6   : > { %v1029_v51 = vadd.f32 %v1025_v48, %v2121_v46  ;;  %v1660_v52 = vpop.f32.mrb[10].mxu0 }
 0x1e7   : > { %v1034_v53 = vsub.f32 %v937_v28, %v1030_v50  ;;  %v1028_v54 = vmul.f32 2.0, %v1660_v52  ;;  %v1016_v55 = vpop.f32.mrb[11].mxu0 }
 0x1e8   : > { %v1033_v56 = vsub.f32 %v936_v31, %v1029_v51  ;;  %v1027_v57 = vmul.f32 2.0, %v1016_v55 }
 0x1e9   : > { %v1032_v58 = vadd.f32 %v1028_v54, %v2136_v60  ;;  %v1039_v62 = vmul.f32 0.33333334, %v1034_v53  ;;  %v1496_v54 = vld [vmem:[%s2308_s6] ss:$0 sm:$0xff] }
 0x1ea   : > { %v1038_v59 = vmul.f32 0.33333334, %v1033_v56  ;;  %v1031_v61 = vadd.f32 %v1027_v57, %v2142_v63  ;;  %v1497_v56 = vld [vmem:[%s2309_s7] ss:$0 sm:$0xff] }
 0x1eb   : > { %v1036_v0 = vsub.f32 %v939_v37, %v1032_v58 }
 0x1ec   : > { %v1035_v1 = vsub.f32 %v938_v38, %v1031_v61  ;;  %1669 = vmatprep.mubr.msk.f32.mxu1 %vm403_vm0, %v1038_v59 }
 0x1ed   : > { %1670 = vmatmul.mubr.msk.f32.vlgmr.msra.gmra.mrb[0].mxu1 %vm403_vm0, %v1039_v62  ;;  %v1041_v46 = vmul.f32 0.33333334, %v1036_v0 }
 0x1ee   : > { %v1040_v49 = vmul.f32 0.33333334, %v1035_v1 }
 0x1f0   : > { %1672 = vmatprep.mubr.msk.f32.mxu1 %vm403_vm0, %v1040_v49 }
 0x1f1   : > { %1673 = vmatmul.mubr.msk.f32.gmra.mrb[2].mxu1 %vm403_vm0, %v1041_v46 }
 0x2c0   : > { %v2195_v2 = vpop.f32.mrb[0].mxu1 }
 0x2c1   : > { %v2197_v3 = vpop.f32.mrb[1].mxu1  ;;  %v1150_v60 = vsel %vm403_vm0, %v2195_v2, 0.0  ;;  %v1164_v63 = vmul.f32 %v2195_v2, %v2195_v2 }
 0x2c2   : > { %1151 = vadd.xlane.f32.xlu0 %v1150_v60  ;;  %v1163_v5 = vmul.f32 %v2197_v3, %v2197_v3  ;;  %v1147_v8 = vsel %vm403_vm0, %v2197_v3, 0.0 }
 0x2c3   : > { %v1170_v4 = vsel %vm403_vm0, %v1164_v63, 0.0 }
 0x2c4   : > { %1171 = vadd.xlane.f32.xlu1 %v1170_v4  ;;  %v2206_v6 = vpop.f32.mrb[2].mxu1  ;;  %v1167_v9 = vsel %vm403_vm0, %v1163_v5, 0.0 }
 0x2c5   : > { %v2208_v7 = vpop.f32.mrb[3].mxu1  ;;  %v1156_v12 = vsel %vm403_vm0, %v2206_v6, 0.0  ;;  %v1166_v13 = vmul.f32 %v2206_v6, %v2206_v6 }
 0x2c6   : > { %1148 = vadd.xlane.f32.xlu0 %v1147_v8  ;;  %v1165_v10 = vmul.f32 %v2208_v7, %v2208_v7  ;;  %v1153_v11 = vsel %vm403_vm0, %v2208_v7, 0.0 }
 0x2c7   : > { %v1176_v15 = vsel %vm403_vm0, %v1166_v13, 0.0 }
 0x2c8   : > { %1168 = vadd.xlane.f32.xlu1 %v1167_v9  ;;  %v1173_v14 = vsel %vm403_vm0, %v1165_v10, 0.0 }
 0x2ca   : > { %1154 = vadd.xlane.f32.xlu0 %v1153_v11 }
 0x2cc   : > { %1157 = vadd.xlane.f32.xlu1 %v1156_v12 }
 0x2ce   : > { %1174 = vadd.xlane.f32.xlu0 %v1173_v14 }
 0x2d0   : > { %1177 = vadd.xlane.f32.xlu1 %v1176_v15 }
 0x34f   : > { %v1152_v22 = vpop.xlane.xlu0 %1151 }
 0x350   : > { %v1160_v23 = vmul.f32 0.03125, %v1152_v22 }
 0x351   : > { %v1172_v24 = vpop.xlane.xlu1 %1171 }
 0x352   : > { %v1184_v25 = vmul.f32 %v1160_v23, %v1160_v23  ;;  %v1180_v26 = vmul.f32 0.03125, %v1172_v24  ;;  %v1192_v51 = vsub.f32 %v2195_v2, %v1160_v23 }
 0x353   : > { %v1149_v27 = vpop.xlane.xlu0 %1148 }
 0x354   : > { %v1188_v28 = vsub.f32 %v1180_v26, %v1184_v25  ;;  %v1159_v30 = vmul.f32 0.03125, %v1149_v27 }
 0x355   : > { %v1169_v31 = vpop.xlane.xlu1 %1168 }
 0x356   : > { %v1196_v32 = vadd.f32 1e-05, %v1188_v28  ;;  %v1183_v33 = vmul.f32 %v1159_v30, %v1159_v30  ;;  %v1179_v34 = vmul.f32 0.03125, %v1169_v31  ;;  %v1191_v57 = vsub.f32 %v2197_v3, %v1159_v30  ;;  %v1502_v28 = vld [vmem:[%s2311_s9] ss:$0 sm:$0xff] }
 0x357   : > { %v1155_v35 = vpop.xlane.xlu0 %1154 }
 0x358   : > { %1818 = vrsqrt.f32 %v1196_v32  ;;  %v1187_v36 = vsub.f32 %v1179_v34, %v1183_v33  ;;  %v1161_v37 = vmul.f32 0.03125, %v1155_v35 }
 0x359   : > { %v1158_v38 = vpop.xlane.xlu1 %1157 }
 0x35a   : > { %v1195_v39 = vadd.f32 1e-05, %v1187_v36  ;;  %v1162_v40 = vmul.f32 0.03125, %v1158_v38  ;;  %v1185_v29 = vmul.f32 %v1161_v37, %v1161_v37  ;;  %v1193_v49 = vsub.f32 %v2208_v7, %v1161_v37 }
 0x35b   : > { %v1175_v41 = vpop.xlane.xlu0 %1174 }
 0x35c   : > { %1820 = vrsqrt.f32 %v1195_v39  ;;  %v1181_v42 = vmul.f32 0.03125, %v1175_v41  ;;  %v1186_v44 = vmul.f32 %v1162_v40, %v1162_v40  ;;  %v1194_v60 = vsub.f32 %v2206_v6, %v1162_v40 }
 0x35d   : > { %v1178_v43 = vpop.xlane.xlu1 %1177 }
 0x35e   : > { %v1189_v45 = vsub.f32 %v1181_v42, %v1185_v29  ;;  %v1182_v47 = vmul.f32 0.03125, %v1178_v43 }
 0x360   : > { %v1197_v48 = vadd.f32 1e-05, %v1189_v45  ;;  %v1190_v50 = vsub.f32 %v1182_v47, %v1186_v44 }
 0x362   : > { %v1819_v52 = vpop.eup %1818  ;;  %1822 = vrsqrt.f32 %v1197_v48  ;;  %v1198_v53 = vadd.f32 1e-05, %v1190_v50 }
 0x363   : > { %v1204_v55 = vmul.f32 %v1819_v52, %v1192_v51 }
 0x364   : > { %1824 = vrsqrt.f32 %v1198_v53 }
 0x365   : > { %v1215_v58 = vmul.f32 %v1496_v54, %v1204_v55 }
 0x366   : > { %v1821_v59 = vpop.eup %1820 }
 0x367   : > { %v1203_v61 = vmul.f32 %v1821_v59, %v1191_v57  ;;  %v1226_v62 = vadd.f32 %v1497_v56, %v1215_v58 }
 0x369   : > { %v1214_v0 = vmul.f32 %v1496_v54, %v1203_v61  ;;  %v1499_v1 = vmul.f32 -1.442695, %v1226_v62 }
 0x36b   : > { %v1225_v46 = vadd.f32 %v1497_v56, %v1214_v0  ;;  %1826 = vpow2.f32 %v1499_v1 }
 0x36c   : > { %v1823_v2 = vpop.eup %1822 }
 0x36d   : > { %v1498_v63 = vmul.f32 -1.442695, %v1225_v46  ;;  %v1205_v4 = vmul.f32 %v1823_v2, %v1193_v49 }
 0x36e   : > { %v1825_v5 = vpop.eup %1824 }
 0x36f   : > { %1828 = vpow2.f32 %v1498_v63  ;;  %v1216_v8 = vmul.f32 %v1496_v54, %v1205_v4  ;;  %v1206_v9 = vmul.f32 %v1825_v5, %v1194_v60 }
 0x371   : > { %v1227_v3 = vadd.f32 %v1497_v56, %v1216_v8  ;;  %v1217_v10 = vmul.f32 %v1496_v54, %v1206_v9 }
 0x373   : > { %v1500_v11 = vmul.f32 -1.442695, %v1227_v3  ;;  %v1228_v12 = vadd.f32 %v1497_v56, %v1217_v10 }
 0x375   : > { %v1827_v13 = vpop.eup %1826  ;;  %1830 = vpow2.f32 %v1500_v11  ;;  %v1501_v14 = vmul.f32 -1.442695, %v1228_v12 }
 0x376   : > { %v1242_v15 = vadd.f32 1.0, %v1827_v13 }
 0x377   : > { %1832 = vpow2.f32 %v1501_v14 }
 0x378   : > { %1834 = vrcp.f32 %v1242_v15 }
 0x379   : > { %v1829_v7 = vpop.eup %1828 }
 0x37a   : > { %v1241_v16 = vadd.f32 1.0, %v1829_v7 }
 0x37c   : > { %1836 = vrcp.f32 %v1241_v16 }
 0x37f   : > { %v1831_v6 = vpop.eup %1830 }
 0x380   : > { %v1243_v17 = vadd.f32 1.0, %v1831_v6 }
 0x381   : > { %v1833_v18 = vpop.eup %1832 }
 0x382   : > { %1838 = vrcp.f32 %v1243_v17  ;;  %v1244_v19 = vadd.f32 1.0, %v1833_v18  ;;  %v1835_v20 = vpop.eup %1834 }
 0x383   : > { %v1254_v23 = vmul.f32 %v1835_v20, %v1226_v62 }
 0x384   : > { %1840 = vrcp.f32 %v1244_v19 }
 0x386   : > { %v1837_v21 = vpop.eup %1836 }
 0x387   : > { %v1253_v22 = vmul.f32 %v1837_v21, %v1225_v46 }
 0x389   : > { %1683 = vmatprep.mubr.msk.f32.mxu0 %vm403_vm0, %v1253_v22 }
 0x38a   : > { %1684 = vmatmul.mubr.msk.f32.vlgmr.msra.gmra.mrb[12].mxu0 %vm403_vm0, %v1254_v23 }
 0x38c   : > { %v1839_v24 = vpop.eup %1838 }
 0x38d   : > { %v1255_v25 = vmul.f32 %v1839_v24, %v1227_v3 }
 0x38e   : > { %v1841_v26 = vpop.eup %1840 }
 0x38f   : > { %1686 = vmatprep.mubr.msk.f32.mxu0 %vm403_vm0, %v1255_v25  ;;  %v1256_v27 = vmul.f32 %v1841_v26, %v1228_v12 }
 0x391   : > { %1687 = vmatmul.mubr.msk.f32.gmra.mrb[14].mxu0 %vm403_vm0, %v1256_v27 }
 0x45d   : > { %v1685_v30 = vpop.f32.mrb[12].mxu0 }
 0x45e   : > { %v1352_v31 = vadd.f32 %v1685_v30, %v1502_v28  ;;  %v1346_v32 = vpop.f32.mrb[13].mxu0 }
 0x45f   : > { %v1347_v33 = vadd.f32 %v1502_v28, %v1346_v32 }
 0x460   : > { %1366 = vst [vmem:[%s367_s25 + $0x8] sm:$0xff] %v1352_v31 }
 0x461   : > { %1365 = vst [vmem:[%s367_s25] sm:$0xff] %v1347_v33 }
 0x464   : > { %v1688_v34 = vpop.f32.mrb[14].mxu0 }
 0x465   : > { %v1362_v35 = vadd.f32 %v1688_v34, %v1502_v28  ;;  %v1356_v36 = vpop.f32.mrb[15].mxu0 }
 0x466   : > { %v1357_v37 = vadd.f32 %v1502_v28, %v1356_v36 }
 0x467   : > { %1368 = vst [vmem:[%s367_s25 + $0x18] sm:$0xff] %v1362_v35 }
 0x468   : > { %1367 = vst [vmem:[%s367_s25 + $0x10] sm:$0xff] %v1357_v37 }
 0x469   : > { %1870 = shalt.err (!%p1867_p2)
}
 0x46a   : > { %s1871_s12 = scalar_lea.hbm %s2259_s28, 512  ;;  %s1875_s27 = scalar_lea.hbm %s2312_s10, 1024 }
 0x46b   : > { %p1872_p3 = scmp.ne.s32.totalorder %s2259_s28, %s1871_s12  ;;  %p1876_p8 = scmp.lt.u32.totalorder %s2259_s28, %s2312_s10 }
 0x46c   : > { %p1877_p9 = scmp.lt.u32.totalorder %s1875_s27, %s1871_s12  ;;  %p1879_p11 = scmp.lt.u32.totalorder %s1871_s12, %s2259_s28 }
 0x46d   : > { %p1873_p4 = pnand %p1872_p3, %p2023_p5 }
 0x46e   : > { %p1878_p10 = por %p1877_p9, %p1876_p8 }
 0x46f   : > { %p1874_p7 = pneg %p1873_p4 }
 0x470   : > { %p1880_p12 = por %p1879_p11, %p1878_p10 }
 0x472   : > { %p1881_p13 = pnand %p1880_p12, %p1874_p7 }
 0x474   : > { %1884 = shalt.err (!%p1881_p13)
}
 0x475   : > { %s1928_s11 = smov 128   ;;  %s1929_s17 = smov 8  }
 0x476   : > { %1769 = dma.vmem_to_hbm [thread:$0]  (%p2023_p5), %s2254_s21, 512, %s2259_s28, %s2261_s29, %s1928_s11, %s1928_s11, %s1929_s17  }
 0x477 PF: > { %p1781_p0 = scmp.ge.s32.totalorder %s1923_s16, 2  ;;  %s1398_s18 = sand.u32 1, %s1911_s13  }
 0x478   : > { %s1399_s0 = scalar_lea.sflag [#allocation3], %s1398_s18 }
 0x479   : > { %p1776_p1 = pnand %p1781_p0, %p2027_p6 }
 0x47b   : > { %1906 = dma.done.wait (!%p1776_p1), %s1399_s0, 512  }
 0x47c   : > { %1908 = vsyncadd (!%p1776_p1), %s1399_s0, 4294966784  ;;  %p21_p2 = scmp.ge.s32.totalorder %s2010_s19, 4   ;;  %s2318_s13 = smov %s1915_s14 }
 0x47d   : > { %s2319_s14 = smov %s1919_s15  ;;  %s2320_s15 = smov %s2021_s22 }
 0x47e   : > { %s2321_s16 = smov %s2010_s19  ;;  %23 = sbr.rel (!%p21_p2) target bundleno = 6 (0x6), region = 100 }
 0x485   :  { %1404 = vsyncpa [#allocation3], 1 }
 0x486   :  { %1406 = vsyncpa [#allocation3 + $0x1], 1 }
 0x487   :  { %1407 = vsyncpa [#allocation4], 1 }
 0x488   :  { %1409 = vsyncpa [#allocation4 + $0x1], 1 }

</bundles_post_ra>
